<compile_context>
chip_gen: v5e
topology: v5e:2x2
jax: 0.10.0
libtpu: 0.0.40
codegen_flags: <defaults>
</compile_context>

<pallas_src>
import jax
import jax.numpy as jnp
import numpy as np
from jax.experimental import pallas as pl
from jax.experimental.pallas import tpu as pltpu

NumFtr = 300
LAYER_SIZES = [5, 16, 32, 64, 128, NumFtr]
_MIN_SPLIT = 128   # split a one-step grid in two whenever N >= 2*_MIN_SPLIT (v7x: 2 TCs/chip)


def _round_up(n, m):
    return ((n + m - 1) // m) * m


def _sigmoid(y):
    # tanh form: single EUP push per vreg (stock sigmoid = exp + exact f32 divide).
    return 0.5 * (jnp.tanh(0.5 * y) + 1.0)


def mlp_kernel(x_ref,
               w1_ref, b1_ref,
               w2_ref, b2_ref,
               w3_ref, b3_ref,
               w4_ref, b4_ref,
               w5_ref, b5_ref,
               o_ref):
    """One (batch_tile, 5) tile -> full 5-layer MLP -> (batch_tile, 300)."""
    x = x_ref[...].astype(jnp.float32)            # (tile, 5)

    # ---- layer 1 (5 -> 16) on the VPU: K=5 is too small to justify an MXU push.
    h = b1_ref[...] + x[:, 0:1] * w1_ref[0:1, :]
    for k in range(1, LAYER_SIZES[0]):
        h = h + x[:, k:k + 1] * w1_ref[k:k + 1, :]
    h = _sigmoid(h)

    # ---- layers 2..5 on the MXU (bf16 or f32 operands; always f32 accumulation).
    def dense(h, w_ref, b_ref, activate):
        y = jnp.dot(h.astype(w_ref.dtype), w_ref[...],
                    preferred_element_type=jnp.float32)
        y = y + b_ref[...]                        # (1, out) f32 bias, broadcast over rows
        return _sigmoid(y) if activate else y

    h = dense(h, w2_ref, b2_ref, True)            # 16  -> 32
    h = dense(h, w3_ref, b3_ref, True)            # 32  -> 64
    h = dense(h, w4_ref, b4_ref, True)            # 64  -> 128
    out = dense(h, w5_ref, b5_ref, False)         # 128 -> 300 (linear output)
    o_ref[...] = out.astype(o_ref.dtype)


def init_params(key):
    """nn.Linear-style init: U(-1/sqrt(fan_in), 1/sqrt(fan_in)) for W and b.
    Weights in (in, out) layout."""
    params = []
    for i in range(len(LAYER_SIZES) - 1):
        fan_in, fan_out = LAYER_SIZES[i], LAYER_SIZES[i + 1]
        key, kw, kb = jax.random.split(key, 3)
        bound = 1.0 / np.sqrt(fan_in)
        w = jax.random.uniform(kw, (fan_in, fan_out), jnp.float32, -bound, bound)
        b = jax.random.uniform(kb, (1, fan_out), jnp.float32, -bound, bound)
        params.append((w, b))
    return params


def prepare_params(params, *, use_bf16=True):
    """One-time parameter prep (hoisted out of the forward path).
    With use_bf16=True the MXU-layer weights (layers 2..5) are cast to bf16
    (f32 accumulation keeps ~1e-2 relative accuracy); biases stay f32 and
    layer-1 weights stay f32 (it runs on the VPU)."""
    flat = []
    for i, (w, b) in enumerate(params):
        w = jnp.asarray(w, jnp.float32)
        b = jnp.asarray(b, jnp.float32).reshape(1, -1)
        if use_bf16 and i > 0:
            w = w.astype(jnp.bfloat16)
        flat.extend([w, b])
    return tuple(flat)


def nn_regressor_mises_cauchy(x, flat_params, *, batch_tile=1024,
                              out_dtype=jnp.float32, vmem_limit_bytes=None):
    """Pallas forward pass.  x: (N, 5) float32 -> (N, 300) out_dtype.
    flat_params: output of prepare_params()."""
    N, F = x.shape
    assert F == LAYER_SIZES[0]

    # ---- batch tiling (tile is a multiple of 8 sublanes) ---------------------
    tile = _round_up(min(int(batch_tile), _round_up(N, 8)), 8)
    # Keep >= 2 grid steps whenever there is enough work so both of a v7x chip's
    # TensorCores get a "parallel" step; extra step cost (~0.35us) is negligible
    # on v5e/v6e (1 TC).
    if _round_up(N, tile) == tile and N >= 2 * _MIN_SPLIT:
        tile = _round_up((N + 1) // 2, 8)
    n_pad = _round_up(N, tile)
    if n_pad != N:
        x = jnp.pad(x, ((0, n_pad - N), (0, 0)))

    # ---- specs ---------------------------------------------------------------
    x_spec = pl.BlockSpec((tile, F), lambda i: (i, 0))
    # Weights/biases: full-array blocks, constant index map -> VMEM-resident
    # across all grid steps (~0.1-0.2 MB of parameters total).
    param_specs = [pl.BlockSpec(p.shape, lambda i: (0, 0)) for p in flat_params]
    # Output block covers the full 300-lane last dim: written once by the kernel,
    # no wrapper column slice (only an optional cheap row slice for padding).
    out_spec = pl.BlockSpec((tile, NumFtr), lambda i: (i, 0))

    cp_kwargs = dict(dimension_semantics=("parallel",))
    if vmem_limit_bytes is not None:
        # Only needed for very large batch tiles; defaults suffice for tile<=2048.
        cp_kwargs["vmem_limit_bytes"] = int(vmem_limit_bytes)

    out = pl.pallas_call(
        mlp_kernel,
        out_shape=jax.ShapeDtypeStruct((n_pad, NumFtr), out_dtype),
        grid_spec=pltpu.PrefetchScalarGridSpec(
            num_scalar_prefetch=0,
            grid=(n_pad // tile,),
            in_specs=[x_spec] + param_specs,
            out_specs=out_spec,
        ),
        compiler_params=pltpu.CompilerParams(**cp_kwargs),
    )(x, *flat_params)

    return out if n_pad == N else out[:N]


def reference_forward(x, params):
    """Pure-JAX reference (mirrors the PyTorch nn.Sequential exactly)."""
    h = x
    for i, (w, b) in enumerate(params):
        h = h @ w + b
        if i < len(params) - 1:
            h = jax.nn.sigmoid(h)
    return h


if __name__ == "__main__":
    key = jax.random.PRNGKey(0)
    kx, kp = jax.random.split(key)

    params = init_params(kp)

    # Small batch, not a multiple of 8 -> exercises the row-padding path.
    N = 100
    x = jax.random.normal(kx, (N, LAYER_SIZES[0]), jnp.float32)
    ref = reference_forward(x, params)

    # Default fast path: bf16 MXU operands, f32 accumulation (~1e-2 rel. accuracy).
    flat_bf16 = prepare_params(params, use_bf16=True)
    out = jax.block_until_ready(nn_regressor_mises_cauchy(x, flat_bf16))
    assert out.shape == (N, NumFtr), out.shape
    np.testing.assert_allclose(np.asarray(out), np.asarray(ref), rtol=2e-2, atol=2e-2)

    # Exact f32 path.
    flat_f32 = prepare_params(params, use_bf16=False)
    out_f32 = jax.block_until_ready(nn_regressor_mises_cauchy(x, flat_f32))
    np.testing.assert_allclose(np.asarray(out_f32), np.asarray(ref),
                               rtol=1e-5, atol=1e-5)

    # Tiny sub-tile batch (padded up to one 8-row tile) also works.
    x_small = jax.random.normal(kx, (6, LAYER_SIZES[0]), jnp.float32)
    out_small = jax.block_until_ready(nn_regressor_mises_cauchy(x_small, flat_f32))
    np.testing.assert_allclose(np.asarray(out_small),
                               np.asarray(reference_forward(x_small, params)),
                               rtol=1e-5, atol=1e-5)

    print("KERNEL_OK")
</pallas_src>

<mosaic_0001>
module attributes {stable_mosaic.version = 11 : i64} {
  func.func @mlp_kernel(%arg0: i32, %arg1: memref<104x5xf32, #tpu.memory_space<vmem>>, %arg2: memref<5x16xf32, #tpu.memory_space<vmem>>, %arg3: memref<1x16xf32, #tpu.memory_space<vmem>>, %arg4: memref<16x32xbf16, #tpu.memory_space<vmem>>, %arg5: memref<1x32xf32, #tpu.memory_space<vmem>>, %arg6: memref<32x64xbf16, #tpu.memory_space<vmem>>, %arg7: memref<1x64xf32, #tpu.memory_space<vmem>>, %arg8: memref<64x128xbf16, #tpu.memory_space<vmem>>, %arg9: memref<1x128xf32, #tpu.memory_space<vmem>>, %arg10: memref<128x300xbf16, #tpu.memory_space<vmem>>, %arg11: memref<1x300xf32, #tpu.memory_space<vmem>>, %arg12: memref<104x300xf32, #tpu.memory_space<vmem>>) attributes {dimension_semantics = [#tpu.dimension_semantics<parallel>], iteration_bounds = array<i64: 1>, scalar_prefetch = 0 : i64, scratch_operands = 0 : i64, tpu.core_type = #tpu.core_type<tc>, window_params = [{transform_indices = @transform_0, window_bounds = array<i64: 104, 5>}, {pipeline_mode = #tpu.pipeline_mode<synchronous>, transform_indices = @transform_1, window_bounds = array<i64: 5, 16>}, {pipeline_mode = #tpu.pipeline_mode<synchronous>, transform_indices = @transform_2, window_bounds = array<i64: 1, 16>}, {pipeline_mode = #tpu.pipeline_mode<synchronous>, transform_indices = @transform_3, window_bounds = array<i64: 16, 32>}, {pipeline_mode = #tpu.pipeline_mode<synchronous>, transform_indices = @transform_4, window_bounds = array<i64: 1, 32>}, {pipeline_mode = #tpu.pipeline_mode<synchronous>, transform_indices = @transform_5, window_bounds = array<i64: 32, 64>}, {pipeline_mode = #tpu.pipeline_mode<synchronous>, transform_indices = @transform_6, window_bounds = array<i64: 1, 64>}, {pipeline_mode = #tpu.pipeline_mode<synchronous>, transform_indices = @transform_7, window_bounds = array<i64: 64, 128>}, {pipeline_mode = #tpu.pipeline_mode<synchronous>, transform_indices = @transform_8, window_bounds = array<i64: 1, 128>}, {pipeline_mode = #tpu.pipeline_mode<synchronous>, transform_indices = @transform_9, window_bounds = array<i64: 128, 300>}, {pipeline_mode = #tpu.pipeline_mode<synchronous>, transform_indices = @transform_10, window_bounds = array<i64: 1, 300>}, {transform_indices = @transform_11, window_bounds = array<i64: 104, 300>}]} {
    %c0 = arith.constant 0 : index
    %c0_0 = arith.constant 0 : index
    %0 = vector.load %arg1[%c0, %c0_0] : memref<104x5xf32, #tpu.memory_space<vmem>>, vector<104x5xf32>
    %c0_1 = arith.constant 0 : index
    %c0_2 = arith.constant 0 : index
    %1 = vector.load %arg3[%c0_1, %c0_2] : memref<1x16xf32, #tpu.memory_space<vmem>>, vector<1x16xf32>
    %2 = vector.extract_strided_slice %0 {offsets = [0, 0], sizes = [104, 1], strides = [1, 1]} : vector<104x5xf32> to vector<104x1xf32>
    %c0_3 = arith.constant 0 : index
    %c0_4 = arith.constant 0 : index
    %3 = vector.load %arg2[%c0_3, %c0_4] : memref<5x16xf32, #tpu.memory_space<vmem>>, vector<1x16xf32>
    %4 = vector.broadcast %2 : vector<104x1xf32> to vector<104x16xf32>
    %5 = vector.broadcast %3 : vector<1x16xf32> to vector<104x16xf32>
    %6 = arith.mulf %4, %5 : vector<104x16xf32>
    %7 = vector.broadcast %1 : vector<1x16xf32> to vector<104x16xf32>
    %8 = arith.addf %7, %6 : vector<104x16xf32>
    %9 = vector.extract_strided_slice %0 {offsets = [0, 1], sizes = [104, 1], strides = [1, 1]} : vector<104x5xf32> to vector<104x1xf32>
    %c1 = arith.constant 1 : index
    %c0_5 = arith.constant 0 : index
    %10 = vector.load %arg2[%c1, %c0_5] : memref<5x16xf32, #tpu.memory_space<vmem>>, vector<1x16xf32>
    %11 = vector.broadcast %9 : vector<104x1xf32> to vector<104x16xf32>
    %12 = vector.broadcast %10 : vector<1x16xf32> to vector<104x16xf32>
    %13 = arith.mulf %11, %12 : vector<104x16xf32>
    %14 = arith.addf %8, %13 : vector<104x16xf32>
    %15 = vector.extract_strided_slice %0 {offsets = [0, 2], sizes = [104, 1], strides = [1, 1]} : vector<104x5xf32> to vector<104x1xf32>
    %c2 = arith.constant 2 : index
    %c0_6 = arith.constant 0 : index
    %16 = vector.load %arg2[%c2, %c0_6] : memref<5x16xf32, #tpu.memory_space<vmem>>, vector<1x16xf32>
    %17 = vector.broadcast %15 : vector<104x1xf32> to vector<104x16xf32>
    %18 = vector.broadcast %16 : vector<1x16xf32> to vector<104x16xf32>
    %19 = arith.mulf %17, %18 : vector<104x16xf32>
    %20 = arith.addf %14, %19 : vector<104x16xf32>
    %21 = vector.extract_strided_slice %0 {offsets = [0, 3], sizes = [104, 1], strides = [1, 1]} : vector<104x5xf32> to vector<104x1xf32>
    %c3 = arith.constant 3 : index
    %c0_7 = arith.constant 0 : index
    %22 = vector.load %arg2[%c3, %c0_7] : memref<5x16xf32, #tpu.memory_space<vmem>>, vector<1x16xf32>
    %23 = vector.broadcast %21 : vector<104x1xf32> to vector<104x16xf32>
    %24 = vector.broadcast %22 : vector<1x16xf32> to vector<104x16xf32>
    %25 = arith.mulf %23, %24 : vector<104x16xf32>
    %26 = arith.addf %20, %25 : vector<104x16xf32>
    %27 = vector.extract_strided_slice %0 {offsets = [0, 4], sizes = [104, 1], strides = [1, 1]} : vector<104x5xf32> to vector<104x1xf32>
    %c4 = arith.constant 4 : index
    %c0_8 = arith.constant 0 : index
    %28 = vector.load %arg2[%c4, %c0_8] : memref<5x16xf32, #tpu.memory_space<vmem>>, vector<1x16xf32>
    %29 = vector.broadcast %27 : vector<104x1xf32> to vector<104x16xf32>
    %30 = vector.broadcast %28 : vector<1x16xf32> to vector<104x16xf32>
    %31 = arith.mulf %29, %30 : vector<104x16xf32>
    %32 = arith.addf %26, %31 : vector<104x16xf32>
    %cst = arith.constant 5.000000e-01 : f32
    %33 = vector.broadcast %cst : f32 to vector<104x16xf32>
    %34 = arith.mulf %33, %32 : vector<104x16xf32>
    %35 = math.tanh %34 : vector<104x16xf32>
    %cst_9 = arith.constant 1.000000e+00 : f32
    %36 = vector.broadcast %cst_9 : f32 to vector<104x16xf32>
    %37 = arith.addf %35, %36 : vector<104x16xf32>
    %cst_10 = arith.constant 5.000000e-01 : f32
    %38 = vector.broadcast %cst_10 : f32 to vector<104x16xf32>
    %39 = arith.mulf %38, %37 : vector<104x16xf32>
    %40 = arith.truncf %39 : vector<104x16xf32> to vector<104x16xbf16>
    %c0_11 = arith.constant 0 : index
    %c0_12 = arith.constant 0 : index
    %41 = vector.load %arg4[%c0_11, %c0_12] : memref<16x32xbf16, #tpu.memory_space<vmem>>, vector<16x32xbf16>
    %cst_13 = arith.constant dense<0.000000e+00> : vector<104x32xf32>
    %42 = tpu.matmul %40, %41, %cst_13 {dimension_numbers = #tpu.dot_dimension_numbers<[1], [0], [0], [1], [0, 0, 1, 1], [], []>} : vector<104x16xbf16>, vector<16x32xbf16>, vector<104x32xf32> -> vector<104x32xf32>
    %c0_14 = arith.constant 0 : index
    %c0_15 = arith.constant 0 : index
    %43 = vector.load %arg5[%c0_14, %c0_15] : memref<1x32xf32, #tpu.memory_space<vmem>>, vector<1x32xf32>
    %44 = vector.broadcast %43 : vector<1x32xf32> to vector<104x32xf32>
    %45 = arith.addf %42, %44 : vector<104x32xf32>
    %cst_16 = arith.constant 5.000000e-01 : f32
    %46 = vector.broadcast %cst_16 : f32 to vector<104x32xf32>
    %47 = arith.mulf %46, %45 : vector<104x32xf32>
    %48 = math.tanh %47 : vector<104x32xf32>
    %cst_17 = arith.constant 1.000000e+00 : f32
    %49 = vector.broadcast %cst_17 : f32 to vector<104x32xf32>
    %50 = arith.addf %48, %49 : vector<104x32xf32>
    %cst_18 = arith.constant 5.000000e-01 : f32
    %51 = vector.broadcast %cst_18 : f32 to vector<104x32xf32>
    %52 = arith.mulf %51, %50 : vector<104x32xf32>
    %53 = arith.truncf %52 : vector<104x32xf32> to vector<104x32xbf16>
    %c0_19 = arith.constant 0 : index
    %c0_20 = arith.constant 0 : index
    %54 = vector.load %arg6[%c0_19, %c0_20] : memref<32x64xbf16, #tpu.memory_space<vmem>>, vector<32x64xbf16>
    %cst_21 = arith.constant dense<0.000000e+00> : vector<104x64xf32>
    %55 = tpu.matmul %53, %54, %cst_21 {dimension_numbers = #tpu.dot_dimension_numbers<[1], [0], [0], [1], [0, 0, 1, 1], [], []>} : vector<104x32xbf16>, vector<32x64xbf16>, vector<104x64xf32> -> vector<104x64xf32>
    %c0_22 = arith.constant 0 : index
    %c0_23 = arith.constant 0 : index
    %56 = vector.load %arg7[%c0_22, %c0_23] : memref<1x64xf32, #tpu.memory_space<vmem>>, vector<1x64xf32>
    %57 = vector.broadcast %56 : vector<1x64xf32> to vector<104x64xf32>
    %58 = arith.addf %55, %57 : vector<104x64xf32>
    %cst_24 = arith.constant 5.000000e-01 : f32
    %59 = vector.broadcast %cst_24 : f32 to vector<104x64xf32>
    %60 = arith.mulf %59, %58 : vector<104x64xf32>
    %61 = math.tanh %60 : vector<104x64xf32>
    %cst_25 = arith.constant 1.000000e+00 : f32
    %62 = vector.broadcast %cst_25 : f32 to vector<104x64xf32>
    %63 = arith.addf %61, %62 : vector<104x64xf32>
    %cst_26 = arith.constant 5.000000e-01 : f32
    %64 = vector.broadcast %cst_26 : f32 to vector<104x64xf32>
    %65 = arith.mulf %64, %63 : vector<104x64xf32>
    %66 = arith.truncf %65 : vector<104x64xf32> to vector<104x64xbf16>
    %c0_27 = arith.constant 0 : index
    %c0_28 = arith.constant 0 : index
    %67 = vector.load %arg8[%c0_27, %c0_28] : memref<64x128xbf16, #tpu.memory_space<vmem>>, vector<64x128xbf16>
    %cst_29 = arith.constant dense<0.000000e+00> : vector<104x128xf32>
    %68 = tpu.matmul %66, %67, %cst_29 {dimension_numbers = #tpu.dot_dimension_numbers<[1], [0], [0], [1], [0, 0, 1, 1], [], []>} : vector<104x64xbf16>, vector<64x128xbf16>, vector<104x128xf32> -> vector<104x128xf32>
    %c0_30 = arith.constant 0 : index
    %c0_31 = arith.constant 0 : index
    %69 = vector.load %arg9[%c0_30, %c0_31] : memref<1x128xf32, #tpu.memory_space<vmem>>, vector<1x128xf32>
    %70 = vector.broadcast %69 : vector<1x128xf32> to vector<104x128xf32>
    %71 = arith.addf %68, %70 : vector<104x128xf32>
    %cst_32 = arith.constant 5.000000e-01 : f32
    %72 = vector.broadcast %cst_32 : f32 to vector<104x128xf32>
    %73 = arith.mulf %72, %71 : vector<104x128xf32>
    %74 = math.tanh %73 : vector<104x128xf32>
    %cst_33 = arith.constant 1.000000e+00 : f32
    %75 = vector.broadcast %cst_33 : f32 to vector<104x128xf32>
    %76 = arith.addf %74, %75 : vector<104x128xf32>
    %cst_34 = arith.constant 5.000000e-01 : f32
    %77 = vector.broadcast %cst_34 : f32 to vector<104x128xf32>
    %78 = arith.mulf %77, %76 : vector<104x128xf32>
    %79 = arith.truncf %78 : vector<104x128xf32> to vector<104x128xbf16>
    %c0_35 = arith.constant 0 : index
    %c0_36 = arith.constant 0 : index
    %80 = vector.load %arg10[%c0_35, %c0_36] : memref<128x300xbf16, #tpu.memory_space<vmem>>, vector<128x300xbf16>
    %cst_37 = arith.constant dense<0.000000e+00> : vector<104x300xf32>
    %81 = tpu.matmul %79, %80, %cst_37 {dimension_numbers = #tpu.dot_dimension_numbers<[1], [0], [0], [1], [0, 0, 1, 1], [], []>} : vector<104x128xbf16>, vector<128x300xbf16>, vector<104x300xf32> -> vector<104x300xf32>
    %c0_38 = arith.constant 0 : index
    %c0_39 = arith.constant 0 : index
    %82 = vector.load %arg11[%c0_38, %c0_39] : memref<1x300xf32, #tpu.memory_space<vmem>>, vector<1x300xf32>
    %83 = vector.broadcast %82 : vector<1x300xf32> to vector<104x300xf32>
    %84 = arith.addf %81, %83 : vector<104x300xf32>
    %c0_40 = arith.constant 0 : index
    %c0_41 = arith.constant 0 : index
    %85 = vector.load %arg12[%c0_40, %c0_41] : memref<104x300xf32, #tpu.memory_space<vmem>>, vector<104x300xf32>
    tpu.vector_store %arg12[%c0_40, %c0_41], %84 {strides = array<i32>} : memref<104x300xf32, #tpu.memory_space<vmem>>, vector<104x300xf32>,
    return
  }
  func.func @transform_0(%arg0: i32) -> (i32, i32) {
    %c0_i32 = arith.constant 0 : i32
    %c0_i32_0 = arith.constant 0 : i32
    return %arg0, %c0_i32 : i32, i32
  }
  func.func @transform_1(%arg0: i32) -> (i32, i32) {
    %c0_i32 = arith.constant 0 : i32
    %c0_i32_0 = arith.constant 0 : i32
    %c0_i32_1 = arith.constant 0 : i32
    return %c0_i32, %c0_i32_0 : i32, i32
  }
  func.func @transform_2(%arg0: i32) -> (i32, i32) {
    %c0_i32 = arith.constant 0 : i32
    %c0_i32_0 = arith.constant 0 : i32
    %c0_i32_1 = arith.constant 0 : i32
    return %c0_i32, %c0_i32_0 : i32, i32
  }
  func.func @transform_3(%arg0: i32) -> (i32, i32) {
    %c0_i32 = arith.constant 0 : i32
    %c0_i32_0 = arith.constant 0 : i32
    %c0_i32_1 = arith.constant 0 : i32
    return %c0_i32, %c0_i32_0 : i32, i32
  }
  func.func @transform_4(%arg0: i32) -> (i32, i32) {
    %c0_i32 = arith.constant 0 : i32
    %c0_i32_0 = arith.constant 0 : i32
    %c0_i32_1 = arith.constant 0 : i32
    return %c0_i32, %c0_i32_0 : i32, i32
  }
  func.func @transform_5(%arg0: i32) -> (i32, i32) {
    %c0_i32 = arith.constant 0 : i32
    %c0_i32_0 = arith.constant 0 : i32
    %c0_i32_1 = arith.constant 0 : i32
    return %c0_i32, %c0_i32_0 : i32, i32
  }
  func.func @transform_6(%arg0: i32) -> (i32, i32) {
    %c0_i32 = arith.constant 0 : i32
    %c0_i32_0 = arith.constant 0 : i32
    %c0_i32_1 = arith.constant 0 : i32
    return %c0_i32, %c0_i32_0 : i32, i32
  }
  func.func @transform_7(%arg0: i32) -> (i32, i32) {
    %c0_i32 = arith.constant 0 : i32
    %c0_i32_0 = arith.constant 0 : i32
    %c0_i32_1 = arith.constant 0 : i32
    return %c0_i32, %c0_i32_0 : i32, i32
  }
  func.func @transform_8(%arg0: i32) -> (i32, i32) {
    %c0_i32 = arith.constant 0 : i32
    %c0_i32_0 = arith.constant 0 : i32
    %c0_i32_1 = arith.constant 0 : i32
    return %c0_i32, %c0_i32_0 : i32, i32
  }
  func.func @transform_9(%arg0: i32) -> (i32, i32) {
    %c0_i32 = arith.constant 0 : i32
    %c0_i32_0 = arith.constant 0 : i32
    %c0_i32_1 = arith.constant 0 : i32
    return %c0_i32, %c0_i32_0 : i32, i32
  }
  func.func @transform_10(%arg0: i32) -> (i32, i32) {
    %c0_i32 = arith.constant 0 : i32
    %c0_i32_0 = arith.constant 0 : i32
    %c0_i32_1 = arith.constant 0 : i32
    return %c0_i32, %c0_i32_0 : i32, i32
  }
  func.func @transform_11(%arg0: i32) -> (i32, i32) {
    %c0_i32 = arith.constant 0 : i32
    %c0_i32_0 = arith.constant 0 : i32
    return %arg0, %c0_i32 : i32, i32
  }
}

</mosaic_0001>

<bundles_post_ra>
// kernel: tpu_custom_call.1
= control target key start
LH: loop header
LB: loop body
LE: loop exit
PB: predicated region body
PF: predicated region fallthrough
CT: control target
= control target key end

     0   :  { %v1658_v0 = vmov 1   ;;  %v1659_v1 = vmov 0   ;;  %v1660_v3 = vmov 2   ;;  %v1661_v6 = vmov 3   ;;  %s2419_s0 = inlined_call_operand.vmem [shape: f32[104,5], index: 0, kind: input, shape index: {}]   ;;  %s2420_s1 = inlined_call_operand.vmem [shape: f32[5,16], index: 1, kind: input, shape index: {}]   ;;  %s2421_s2 = inlined_call_operand.vmem [shape: f32[1,16], index: 2, kind: input, shape index: {}]   ;;  %s2422_s3 = inlined_call_operand.vmem [shape: bf16[16,32], index: 3, kind: input, shape index: {}]   ;;  %s2423_s4 = inlined_call_operand.vmem [shape: f32[1,32], index: 4, kind: input, shape index: {}]   ;;  %s2424_s5 = inlined_call_operand.vmem [shape: bf16[32,64], index: 5, kind: input, shape index: {}]   ;;  %s2425_s6 = inlined_call_operand.vmem [shape: f32[1,64], index: 6, kind: input, shape index: {}]   ;;  %s2426_s7 = inlined_call_operand.vmem [shape: bf16[64,128], index: 7, kind: input, shape index: {}]   ;;  %s2427_s8 = inlined_call_operand.vmem [shape: f32[1,128], index: 8, kind: input, shape index: {}]   ;;  %s2428_s9 = inlined_call_operand.vmem [shape: bf16[128,300], index: 9, kind: input, shape index: {}]   ;;  %s2429_s10 = inlined_call_operand.vmem [shape: f32[1,300], index: 10, kind: input, shape index: {}]   ;;  %s2430_s11 = inlined_call_operand.vmem [shape: f32[104,300], index: 11, kind: output, shape index: {}]  }
   0x1   :  { %1494 = vset.pattern.permute.xlu1 %v1658_v0  ;;  %1493 = vset.pattern.permute.xlu0 %v1659_v1  ;;  %v39_v2 = vld [vmem:[%s2419_s0] sm:$0xff]  ;;  %v40_v4 = vld [vmem:[%s2419_s0 + $0x8] sm:$0xff]  ;;  %v42_v5 = vld [vmem:[%s2419_s0 + $0x18] sm:$0xff]  ;;  %v1662_v7 = vmov 4   ;;  %vm540_vm0 = vcmask 130048   ;;  %vm684_vm1 = vcmask 261120  }
   0x2   :  { %1495 = vset.pattern.permute.xlu2 %v1660_v3  ;;  %151 = vperm.xlu1 %1494, %v39_v2   ;;  %v44_v8 = vld [vmem:[%s2419_s0 + $0x28] sm:$0xff]  ;;  %v41_v9 = vld [vmem:[%s2419_s0 + $0x10] sm:$0xff]  ;;  %v1748_v10 = vld [vmem:[%s2419_s0 + $0x38] sm:$0xff]  ;;  %vm844_vm2 = vcmask 523264   ;;  %vm1267_vm3 = vcmask 359424  }
   0x3   :  { %56 = vperm.xlu0 %1493, %v39_v2   ;;  %231 = vperm.xlu2 %1495, %v39_v2   ;;  %v43_v11 = vld [vmem:[%s2419_s0 + $0x20] sm:$0xff]  ;;  %v1777_v13 = vld [vmem:[%s2419_s0 + $0x48] sm:$0xff]  ;;  %v1786_v14 = vld [vmem:[%s2419_s0 + $0x30] sm:$0xff] }
   0x4   :  { %v1769_v12 = vld [vmem:[%s2419_s0 + $0x40] sm:$0xff]  ;;  %v1830_v29 = vld [vmem:[%s2419_s0 + $0x50] sm:$0xff]  ;;  %v1880_v50 = vld [vmem:[%s2419_s0 + $0x58] sm:$0xff] }
   0x5   :  { %v1820_v26 = vld [vmem:[%s2420_s1] ss:$0 sm:$0xff]  ;;  %v1843_v32 = vld [vmem:[%s2420_s1 + $0x1] ss:$0 sm:$0xff]  ;;  %v1852_v36 = vld [vmem:[%s2420_s1 + $0x2] ss:$0 sm:$0xff] }
   0x6   :  { %v1835_v30 = vld [vmem:[%s2421_s2] ss:$0 sm:$0xff]  ;;  %v1858_v38 = vld [vmem:[%s2420_s1 + $0x3] ss:$0 sm:$0xff]  ;;  %v1869_v42 = vld [vmem:[%s2420_s1 + $0x4] ss:$0 sm:$0xff] }
   0x7   :  { %v1454_v35 = vld [vmem:[%s2422_s3] sm:$0xff] }
   0x8   :  { %569 = vmatpush.bf16.msra.mxu0 %v1454_v35  ;;  %1485 = vmatpush.bf16.msra.mxu3 %v1454_v35 }
   0xa   :  { %155 = vperm.xlu1 %1494, %v40_v4  }
   0xb   :  { %61 = vperm.xlu0 %1493, %v40_v4   ;;  %235 = vperm.xlu2 %1495, %v40_v4  }
  0x12   :  { %1496 = vset.pattern.permute.xlu1 %v1661_v6 }
  0x13   :  { %71 = vperm.xlu0 %1493, %v42_v5   ;;  %1497 = vset.pattern.permute.xlu2 %v1662_v7 }
  0x14   :  { %315 = vperm.xlu1 %1496, %v40_v4   ;;  %391 = vperm.xlu2 %1497, %v39_v2  }
  0x1b   :  { %81 = vperm.xlu0 %1493, %v44_v8  }
  0x1c   :  { %1498 = vset.pattern.permute.xlu1 %v1662_v7  ;;  %1499 = vset.pattern.permute.xlu2 %v1659_v1 }
  0x1d   :  { %395 = vperm.xlu1 %1498, %v40_v4   ;;  %66 = vperm.xlu2 %1499, %v41_v9  }
  0x23   :  { %91 = vperm.xlu0 %1493, %v1748_v10  }
  0x25   :  { %1500 = vset.pattern.permute.xlu1 %v1658_v0  ;;  %1501 = vset.pattern.permute.xlu2 %v1658_v0 }
  0x26   :  { %159 = vperm.xlu1 %1500, %v41_v9   ;;  %163 = vperm.xlu2 %1501, %v42_v5  }
  0x2b   :  { %1516 = vset.pattern.permute.xlu0 %v1661_v6 }
  0x2c   :  { %311 = vperm.xlu0 %1516, %v39_v2  }
  0x2e   :  { %1502 = vset.pattern.permute.xlu1 %v1660_v3  ;;  %1503 = vset.pattern.permute.xlu2 %v1660_v3 }
  0x2f   :  { %239 = vperm.xlu1 %1502, %v41_v9   ;;  %243 = vperm.xlu2 %1503, %v42_v5  }
  0x34   :  { %319 = vperm.xlu0 %1516, %v41_v9  }
  0x37   :  { %1504 = vset.pattern.permute.xlu1 %v1661_v6  ;;  %1505 = vset.pattern.permute.xlu2 %v1662_v7 }
  0x38   :  { %323 = vperm.xlu1 %1504, %v42_v5   ;;  %399 = vperm.xlu2 %1505, %v41_v9  }
  0x3c   :  { %327 = vperm.xlu0 %1516, %v43_v11  }
  0x40   :  { %1506 = vset.pattern.permute.xlu1 %v1662_v7  ;;  %1507 = vset.pattern.permute.xlu2 %v1659_v1 }
  0x41   :  { %403 = vperm.xlu1 %1506, %v42_v5   ;;  %76 = vperm.xlu2 %1507, %v43_v11  }
  0x44   :  { %339 = vperm.xlu0 %1516, %v1748_v10  }
  0x49   :  { %1508 = vset.pattern.permute.xlu1 %v1658_v0  ;;  %1509 = vset.pattern.permute.xlu2 %v1658_v0 }
  0x4a   :  { %167 = vperm.xlu1 %1508, %v43_v11   ;;  %171 = vperm.xlu2 %1509, %v44_v8  }
  0x4c   :  { %343 = vperm.xlu0 %1516, %v1769_v12  }
  0x52   :  { %1510 = vset.pattern.permute.xlu1 %v1660_v3  ;;  %1511 = vset.pattern.permute.xlu2 %v1660_v3 }
  0x53   :  { %247 = vperm.xlu1 %1510, %v43_v11   ;;  %251 = vperm.xlu2 %1511, %v44_v8  }
  0x54   :  { %1530 = vset.pattern.permute.xlu0 %v1662_v7 }
  0x55   :  { %427 = vperm.xlu0 %1530, %v1777_v13  }
  0x5b   :  { %1512 = vset.pattern.permute.xlu1 %v1661_v6  ;;  %1513 = vset.pattern.permute.xlu2 %v1662_v7 }
  0x5c   :  { %331 = vperm.xlu1 %1512, %v44_v8   ;;  %407 = vperm.xlu2 %1513, %v43_v11  }
  0x5d   :  { %v1788_v15 = vpop.permute.xlu2 %231  ;;  %1531 = vset.pattern.permute.xlu0 %v1660_v3 }
  0x5e   :  { %255 = vperm.xlu0 %1531, %v1786_v14   ;;  %v283_v53 = vmul.f32 %v1852_v36, %v1788_v15 }
  0x64   :  { %1514 = vset.pattern.permute.xlu1 %v1662_v7  ;;  %1515 = vset.pattern.permute.xlu2 %v1659_v1 }
  0x65   :  { %411 = vperm.xlu1 %1514, %v44_v8   ;;  %86 = vperm.xlu2 %1515, %v1786_v14   ;;  %v236_v16 = vpop.permute.xlu2 %235 }
  0x66   :  { %271 = vperm.xlu0 %1531, %v1830_v29   ;;  %v284_v41 = vmul.f32 %v1852_v36, %v236_v16 }
  0x6d   :  { %1517 = vset.pattern.permute.xlu1 %v1658_v0  ;;  %1518 = vset.pattern.permute.xlu2 %v1658_v0 }
  0x6e   :  { %175 = vperm.xlu1 %1517, %v1786_v14   ;;  %179 = vperm.xlu2 %1518, %v1748_v10   ;;  %v1799_v17 = vpop.permute.xlu2 %391 }
  0x6f   :  { %1540 = vset.pattern.permute.xlu0 %v1662_v7  ;;  %v443_v62 = vmul.f32 %v1869_v42, %v1799_v17 }
  0x70   :  { %435 = vperm.xlu0 %1540, %v1880_v50  }
  0x74   :  { %v152_v18 = vpop.permute.xlu1 %151 }
  0x75   :  { %v57_v19 = vpop.permute.xlu0 %56  ;;  %v203_v51 = vmul.f32 %v1843_v32, %v152_v18 }
  0x76   :  { %1519 = vset.pattern.permute.xlu1 %v1659_v1  ;;  %1520 = vset.pattern.permute.xlu2 %v1659_v1  ;;  %v120_v39 = vmul.f32 %v1820_v26, %v57_v19 }
  0x77   :  { %96 = vperm.xlu1 %1519, %v1769_v12   ;;  %101 = vperm.xlu2 %1520, %v1777_v13   ;;  %v1805_v20 = vpop.permute.xlu2 %66 }
  0x78   :  { %v136_v46 = vadd.f32 %v1835_v30, %v120_v39  ;;  %v122_v61 = vmul.f32 %v1820_v26, %v1805_v20 }
  0x7a   :  { %v216_v54 = vadd.f32 %v203_v51, %v136_v46  ;;  %v138_v8 = vadd.f32 %v1835_v30, %v122_v61 }
  0x7c   :  { %v156_v21 = vpop.permute.xlu1 %155  ;;  %v296_v58 = vadd.f32 %v283_v53, %v216_v54 }
  0x7d   :  { %v62_v22 = vpop.permute.xlu0 %61  ;;  %v204_v37 = vmul.f32 %v1843_v32, %v156_v21 }
  0x7e   :  { %v121_v27 = vmul.f32 %v1820_v26, %v62_v22 }
  0x7f   :  { %1521 = vset.pattern.permute.xlu1 %v1660_v3  ;;  %1522 = vset.pattern.permute.xlu2 %v1658_v0 }
  0x80   :  { %259 = vperm.xlu1 %1521, %v1748_v10   ;;  %183 = vperm.xlu2 %1522, %v1769_v12   ;;  %v1811_v23 = vpop.permute.xlu2 %163  ;;  %v137_v33 = vadd.f32 %v1835_v30, %v121_v27 }
  0x81   :  { %v206_v20 = vmul.f32 %v1843_v32, %v1811_v23 }
  0x82   :  { %v217_v40 = vadd.f32 %v204_v37, %v137_v33 }
  0x84   :  { %v297_v47 = vadd.f32 %v284_v41, %v217_v40 }
  0x85   :  { %v1813_v24 = vpop.permute.xlu0 %71 }
  0x86   :  { %v316_v25 = vpop.permute.xlu1 %315  ;;  %v123_v11 = vmul.f32 %v1820_v26, %v1813_v24 }
  0x87   :  { %v364_v43 = vmul.f32 %v1858_v38, %v316_v25 }
  0x88   :  { %1523 = vset.pattern.permute.xlu1 %v1658_v0  ;;  %1524 = vset.pattern.permute.xlu2 %v1661_v6 }
  0x89   :  { %187 = vperm.xlu1 %1523, %v1777_v13   ;;  %335 = vperm.xlu2 %1524, %v1786_v14   ;;  %v1825_v28 = vpop.permute.xlu2 %243  ;;  %v377_v52 = vadd.f32 %v364_v43, %v297_v47 }
  0x8a   :  { %v286_v23 = vmul.f32 %v1852_v36, %v1825_v28 }
  0x8d   :  { %v1837_v31 = vpop.permute.xlu0 %81 }
  0x8f   :  { %v396_v34 = vpop.permute.xlu1 %395 }
  0x90   :  { %v444_v48 = vmul.f32 %v1869_v42, %v396_v34 }
  0x91   :  { %1525 = vset.pattern.permute.xlu1 %v1660_v3  ;;  %1526 = vset.pattern.permute.xlu2 %v1660_v3 }
  0x92   :  { %263 = vperm.xlu1 %1525, %v1769_v12   ;;  %267 = vperm.xlu2 %1526, %v1777_v13   ;;  %v400_v45 = vpop.permute.xlu2 %399  ;;  %v457_v55 = vadd.f32 %v444_v48, %v377_v52 }
  0x93   :  { %v445_v21 = vmul.f32 %v1869_v42, %v400_v45 }
  0x94   :  { %v470_v57 = vmul.f32 0.5, %v457_v55 }
  0x95   :  { %v1872_v44 = vpop.permute.xlu0 %91 }
  0x96   :  { %1554 = vtanh.f32 %v470_v57 }
  0x98   :  { %v160_v49 = vpop.permute.xlu1 %159 }
  0x99   :  { %v205_v4 = vmul.f32 %v1843_v32, %v160_v49 }
  0x9a   :  { %1527 = vset.pattern.permute.xlu1 %v1662_v7  ;;  %1528 = vset.pattern.permute.xlu2 %v1662_v7 }
  0x9b   :  { %415 = vperm.xlu1 %1527, %v1786_v14   ;;  %419 = vperm.xlu2 %1528, %v1748_v10   ;;  %v1891_v60 = vpop.permute.xlu2 %76  ;;  %v218_v14 = vadd.f32 %v205_v4, %v138_v8 }
  0x9c   :  { %v1555_v18 = vpop.eup %1554 }
  0x9d   :  { %v496_v25 = vadd.f32 1.0, %v1555_v18 }
  0x9e   :  { %v312_v56 = vpop.permute.xlu0 %311 }
  0x9f   :  { %v363_v59 = vmul.f32 %v1858_v38, %v312_v56  ;;  %v509_v37 = vmul.f32 0.5, %v496_v25 }
  0xa1   :  { %v376_v63 = vadd.f32 %v363_v59, %v296_v58  ;;  %v240_v2 = vpop.permute.xlu1 %239  ;;  %v124_v58 = vmul.f32 %v1820_v26, %v1891_v60 }
  0xa2   :  { %v285_v9 = vmul.f32 %v1852_v36, %v240_v2 }
  0xa3   :  { %v456_v5 = vadd.f32 %v443_v62, %v376_v63  ;;  %1529 = vset.pattern.permute.xlu1 %v1661_v6  ;;  %423 = vperm.xlu2 %1528, %v1769_v12   ;;  %v1911_v12 = vld [vmem:[%s2419_s0 + $0x60] sm:$0xff]  ;;  %v140_v4 = vadd.f32 %v1835_v30, %v124_v58 }
  0xa4   :  { %347 = vperm.xlu1 %1529, %v1777_v13   ;;  %v298_v17 = vadd.f32 %v285_v9, %v218_v14  ;;  %v1906_v19 = vpop.permute.xlu2 %171  ;;  %v139_v13 = vadd.f32 %v1835_v30, %v123_v11  ;;  %439 = vperm.xlu0 %1540, %v1911_v12  }
  0xa5   :  { %v469_v10 = vmul.f32 0.5, %v456_v5 }
  0xa6   :  { %v320_v15 = vpop.permute.xlu0 %319  ;;  %v219_v33 = vadd.f32 %v206_v20, %v139_v13 }
  0xa7   :  { %1556 = vtanh.f32 %v469_v10  ;;  %v365_v16 = vmul.f32 %v1858_v38, %v320_v15  ;;  %v125_v10 = vmul.f32 %v1820_v26, %v1837_v31 }
  0xa8   :  { %v299_v41 = vadd.f32 %v286_v23, %v219_v33 }
  0xa9   :  { %v378_v22 = vadd.f32 %v365_v16, %v298_v17  ;;  %v141_v15 = vadd.f32 %v1835_v30, %v125_v10 }
  0xaa   :  { %v324_v24 = vpop.permute.xlu1 %323 }
  0xab   :  { %1533 = vset.pattern.permute.xlu2 %v1659_v1  ;;  %v458_v34 = vadd.f32 %v445_v21, %v378_v22  ;;  %v366_v39 = vmul.f32 %v1858_v38, %v324_v24 }
  0xac   :  { %1532 = vset.pattern.permute.xlu1 %v1659_v1  ;;  %111 = vperm.xlu2 %1533, %v1880_v50  }
  0xad   :  { %v1557_v27 = vpop.eup %1556  ;;  %106 = vperm.xlu1 %1532, %v1830_v29   ;;  %v471_v43 = vmul.f32 0.5, %v458_v34  ;;  %v252_v46 = vpop.permute.xlu2 %251  ;;  %v379_v48 = vadd.f32 %v366_v39, %v299_v41 }
  0xae   :  { %v495_v35 = vadd.f32 1.0, %v1557_v27  ;;  %v328_v60 = vpop.permute.xlu0 %327 }
  0xaf   :  { %1558 = vtanh.f32 %v471_v43  ;;  %v367_v11 = vmul.f32 %v1858_v38, %v328_v60 }
  0xb0   :  { %v508_v40 = vmul.f32 0.5, %v495_v35 }
  0xb2   :  { %v521_v45 = vpack.c.bf16 %v509_v37, %v508_v40 }
  0xb3   :  { %v404_v47 = vpop.permute.xlu1 %403 }
  0xb4   :  { %v446_v49 = vmul.f32 %v1869_v42, %v404_v47  ;;  %1313 = vmatmul.msk.bf16.vlgmr.msra.gmra.mxu0 %vm540_vm0, %v521_v45  ;;  %1535 = vset.pattern.permute.xlu2 %v1658_v0 }
  0xb5   :  { %1534 = vset.pattern.permute.xlu1 %v1658_v0  ;;  %195 = vperm.xlu2 %1535, %v1880_v50   ;;  %v1559_v52 = vpop.eup %1558 }
  0xb6   :  { %v459_v28 = vadd.f32 %v446_v49, %v379_v48  ;;  %191 = vperm.xlu1 %1534, %v1830_v29   ;;  %v408_v54 = vpop.permute.xlu2 %407  ;;  %v497_v55 = vadd.f32 1.0, %v1559_v52  ;;  %v340_v37 = vpop.permute.xlu0 %339 }
  0xb7   :  { %v447_v16 = vmul.f32 %v1869_v42, %v408_v54 }
  0xb8   :  { %v472_v51 = vmul.f32 0.5, %v459_v28  ;;  %v510_v61 = vmul.f32 0.5, %v497_v55 }
  0xba   :  { %1560 = vtanh.f32 %v472_v51 }
  0xbc   :  { %v168_v53 = vpop.permute.xlu1 %167 }
  0xbd   :  { %1537 = vset.pattern.permute.xlu2 %v1661_v6  ;;  %v207_v62 = vmul.f32 %v1843_v32, %v168_v53 }
  0xbe   :  { %1536 = vset.pattern.permute.xlu1 %v1660_v3  ;;  %351 = vperm.xlu2 %1537, %v1830_v29   ;;  %v344_v45 = vpop.permute.xlu0 %343 }
  0xbf   :  { %275 = vperm.xlu1 %1536, %v1880_v50   ;;  %v87_v8 = vpop.permute.xlu2 %86  ;;  %v220_v9 = vadd.f32 %v207_v62, %v140_v4 }
  0xc0   :  { %v1561_v56 = vpop.eup %1560  ;;  %v126_v55 = vmul.f32 %v1820_v26, %v87_v8 }
  0xc1   :  { %v498_v57 = vadd.f32 1.0, %v1561_v56 }
  0xc2   :  { %v142_v62 = vadd.f32 %v1835_v30, %v126_v55 }
  0xc3   :  { %v511_v59 = vmul.f32 0.5, %v498_v57 }
  0xc5   :  { %v248_v63 = vpop.permute.xlu1 %247  ;;  %v522_v2 = vpack.c.bf16 %v511_v59, %v510_v61  ;;  %v370_v59 = vmul.f32 %v1858_v38, %v340_v37 }
  0xc6   :  { %v287_v5 = vmul.f32 %v1852_v36, %v248_v63  ;;  %1539 = vset.pattern.permute.xlu2 %v1662_v7  ;;  %v208_v7 = vmul.f32 %v1843_v32, %v1906_v19 }
  0xc7   :  { %1538 = vset.pattern.permute.xlu1 %v1661_v6  ;;  %1314 = vmatmul.msk.bf16.gmra.mxu0 %vm540_vm0, %v522_v2  ;;  %v428_v49 = vpop.permute.xlu0 %427 }
  0xc8   :  { %355 = vperm.xlu1 %1538, %v1880_v50   ;;  %431 = vperm.xlu2 %1539, %v1830_v29   ;;  %v300_v14 = vadd.f32 %v287_v5, %v220_v9  ;;  %v180_v29 = vpop.permute.xlu2 %179  ;;  %v221_v31 = vadd.f32 %v208_v7, %v141_v15  ;;  %v288_v50 = vmul.f32 %v1852_v36, %v252_v46 }
  0xc9   :  { %v210_v51 = vmul.f32 %v1843_v32, %v180_v29  ;;  %v371_v29 = vmul.f32 %v1858_v38, %v344_v45  ;;  %v452_v37 = vmul.f32 %v1869_v42, %v428_v49  ;;  %v1456_v49 = vld [vmem:[%s2424_s5 + $0x8] sm:$0xff] }
  0xca   :  { %v380_v17 = vadd.f32 %v367_v11, %v300_v14  ;;  %v301_v19 = vadd.f32 %v288_v50, %v221_v31  ;;  %712 = vmatpush.bf16.msra.mxu1 %v1456_v49  ;;  %1486 = vmatpush.bf16.msra.mxu2 %v1456_v49 }
  0xcc   :  { %v460_v13 = vadd.f32 %v447_v16, %v380_v17 }
  0xce   :  { %v332_v18 = vpop.permute.xlu1 %331  ;;  %v473_v21 = vmul.f32 0.5, %v460_v13 }
  0xcf   :  { %v368_v20 = vmul.f32 %v1858_v38, %v332_v18 }
  0xd0   :  { %1541 = vset.pattern.permute.xlu1 %v1659_v1  ;;  %1542 = vset.pattern.permute.xlu2 %v1658_v0  ;;  %1562 = vtanh.f32 %v473_v21  ;;  %v256_v61 = vpop.permute.xlu0 %255 }
  0xd1   :  { %116 = vperm.xlu1 %1541, %v1911_v12   ;;  %199 = vperm.xlu2 %1542, %v1911_v12   ;;  %v381_v24 = vadd.f32 %v368_v20, %v301_v19  ;;  %v102_v1 = vpop.permute.xlu2 %101  ;;  %v289_v60 = vmul.f32 %v1852_v36, %v256_v61 }
  0xd2   :  { %v129_v31 = vmul.f32 %v1820_v26, %v102_v1 }
  0xd6   :  { %v1563_v33 = vpop.eup %1562 }
  0xd7   :  { %v412_v22 = vpop.permute.xlu1 %411  ;;  %v499_v34 = vadd.f32 1.0, %v1563_v33 }
  0xd8   :  { %v448_v25 = vmul.f32 %v1869_v42, %v412_v22 }
  0xd9   :  { %1543 = vset.pattern.permute.xlu1 %v1660_v3  ;;  %1544 = vset.pattern.permute.xlu2 %v1661_v6  ;;  %v512_v3 = vmul.f32 0.5, %v499_v34 }
  0xda   :  { %v461_v0 = vadd.f32 %v448_v25, %v381_v24  ;;  %279 = vperm.xlu1 %1543, %v1911_v12   ;;  %359 = vperm.xlu2 %1544, %v1911_v12   ;;  %v184_v40 = vpop.permute.xlu2 %183  ;;  %v127_v12 = vmul.f32 %v1820_v26, %v1872_v44  ;;  %v145_v25 = vadd.f32 %v1835_v30, %v129_v31 }
  0xdb   :  { %v211_v5 = vmul.f32 %v1843_v32, %v184_v40 }
  0xdc   :  { %v474_v27 = vmul.f32 0.5, %v461_v0  ;;  %v143_v28 = vadd.f32 %v1835_v30, %v127_v12 }
  0xde   :  { %1564 = vtanh.f32 %v474_v27  ;;  %v223_v54 = vadd.f32 %v210_v51, %v143_v28 }
  0xe0   :  { %v176_v23 = vpop.permute.xlu1 %175 }
  0xe1   :  { %v209_v44 = vmul.f32 %v1843_v32, %v176_v23 }
  0xe3   :  { %v336_v46 = vpop.permute.xlu2 %335  ;;  %v222_v8 = vadd.f32 %v209_v44, %v142_v62 }
  0xe4   :  { %v1565_v35 = vpop.eup %1564  ;;  %v369_v7 = vmul.f32 %v1858_v38, %v336_v46 }
  0xe5   :  { %v500_v39 = vadd.f32 1.0, %v1565_v35  ;;  %v302_v15 = vadd.f32 %v289_v60, %v222_v8  ;;  %v2004_v60 = vld [vmem:[%s2423_s4] ss:$0 sm:$0xff] }
  0xe7   :  { %v513_v41 = vmul.f32 0.5, %v500_v39  ;;  %v382_v13 = vadd.f32 %v369_v7, %v302_v15 }
  0xe9   :  { %v97_v43 = vpop.permute.xlu1 %96  ;;  %v523_v6 = vpack.c.bf16 %v513_v41, %v512_v3 }
  0xea   :  { %v128_v57 = vmul.f32 %v1820_v26, %v97_v43 }
  0xeb   :  { %1315 = vmatmul.msk.bf16.gmra.mxu0 %vm540_vm0, %v523_v6 }
  0xec   :  { %v268_v48 = vpop.permute.xlu2 %267  ;;  %v144_v9 = vadd.f32 %v1835_v30, %v128_v57 }
  0xed   :  { %v292_v33 = vmul.f32 %v1852_v36, %v268_v48 }
  0xee   :  { %v224_v14 = vadd.f32 %v211_v5, %v144_v9 }
  0xf2   :  { %v260_v47 = vpop.permute.xlu1 %259 }
  0xf3   :  { %v290_v53 = vmul.f32 %v1852_v36, %v260_v47 }
  0xf5   :  { %v303_v56 = vadd.f32 %v290_v53, %v223_v54  ;;  %v420_v58 = vpop.permute.xlu2 %419 }
  0xf6   :  { %v450_v2 = vmul.f32 %v1869_v42, %v420_v58 }
  0xf7   :  { %v383_v63 = vadd.f32 %v370_v59, %v303_v56  ;;  %v1455_v59 = vld [vmem:[%s2424_s5] sm:$0xff] }
  0xf8   :  { %713 = vmatpush.bf16.msra.mxu1 %v1455_v59  ;;  %1487 = vmatpush.bf16.msra.mxu2 %v1455_v59 }
  0xf9   :  { %v463_v11 = vadd.f32 %v450_v2, %v383_v63 }
  0xfb   :  { %v188_v52 = vpop.permute.xlu1 %187  ;;  %v476_v18 = vmul.f32 0.5, %v463_v11 }
  0xfc   :  { %v212_v19 = vmul.f32 %v1843_v32, %v188_v52 }
  0xfd   :  { %v424_v16 = vpop.permute.xlu2 %423  ;;  %1566 = vtanh.f32 %v476_v18 }
  0xfe   :  { %v451_v22 = vmul.f32 %v1869_v42, %v424_v16  ;;  %v225_v23 = vadd.f32 %v212_v19, %v145_v25 }
 0x100   :  { %v305_v40 = vadd.f32 %v292_v33, %v225_v23 }
 0x103   :  { %v1567_v1 = vpop.eup %1566 }
 0x104   :  { %v264_v4 = vpop.permute.xlu1 %263  ;;  %v502_v3 = vadd.f32 1.0, %v1567_v1 }
 0x105   :  { %v291_v10 = vmul.f32 %v1852_v36, %v264_v4  ;;  %v272_v4 = vpop.permute.xlu0 %271 }
 0x106   :  { %v112_v27 = vpop.permute.xlu2 %111  ;;  %v515_v12 = vmul.f32 0.5, %v502_v3  ;;  %v293_v8 = vmul.f32 %v1852_v36, %v272_v4 }
 0x107   :  { %v304_v17 = vadd.f32 %v291_v10, %v224_v14  ;;  %v131_v15 = vmul.f32 %v1820_v26, %v112_v27 }
 0x109   :  { %v384_v21 = vadd.f32 %v371_v29, %v304_v17  ;;  %v147_v31 = vadd.f32 %v1835_v30, %v131_v15 }
 0x10b   :  { %v464_v34 = vadd.f32 %v451_v22, %v384_v21 }
 0x10d   :  { %v416_v50 = vpop.permute.xlu1 %415  ;;  %v477_v39 = vmul.f32 0.5, %v464_v34 }
 0x10e   :  { %v449_v20 = vmul.f32 %v1869_v42, %v416_v50 }
 0x10f   :  { %v196_v47 = vpop.permute.xlu2 %195 }
 0x110   :  { %v462_v24 = vadd.f32 %v449_v20, %v382_v13  ;;  %v214_v50 = vmul.f32 %v1843_v32, %v196_v47 }
 0x112   :  { %v475_v0 = vmul.f32 0.5, %v462_v24  ;;  %v227_v21 = vadd.f32 %v214_v50, %v147_v31  ;;  %v436_v24 = vpop.permute.xlu0 %435 }
 0x113   :  { %v454_v23 = vmul.f32 %v1869_v42, %v436_v24 }
 0x114   :  { %1568 = vtanh.f32 %v475_v0 }
 0x115   :  { %1570 = vtanh.f32 %v477_v39 }
 0x116   :  { %v348_v35 = vpop.permute.xlu1 %347 }
 0x117   :  { %v372_v41 = vmul.f32 %v1858_v38, %v348_v35 }
 0x118   :  { %v352_v57 = vpop.permute.xlu2 %351 }
 0x119   :  { %v385_v43 = vadd.f32 %v372_v41, %v305_v40  ;;  %v373_v10 = vmul.f32 %v1858_v38, %v352_v57 }
 0x11a   :  { %v1569_v6 = vpop.eup %1568 }
 0x11b   :  { %v501_v45 = vadd.f32 1.0, %v1569_v6  ;;  %v465_v46 = vadd.f32 %v452_v37, %v385_v43  ;;  %v1571_v53 = vpop.eup %1570 }
 0x11c   :  { %v503_v54 = vadd.f32 1.0, %v1571_v53 }
 0x11d   :  { %v514_v48 = vmul.f32 0.5, %v501_v45  ;;  %v478_v28 = vmul.f32 0.5, %v465_v46 }
 0x11e   :  { %v516_v44 = vmul.f32 0.5, %v503_v54 }
 0x11f   :  { %1572 = vtanh.f32 %v478_v28  ;;  %v107_v51 = vpop.permute.xlu1 %106  ;;  %v524_v52 = vpack.c.bf16 %v515_v12, %v514_v48 }
 0x120   :  { %v130_v56 = vmul.f32 %v1820_v26, %v107_v51 }
 0x121   :  { %1316 = vmatmul.msk.bf16.gmra.mxu0 %vm540_vm0, %v524_v52 }
 0x122   :  { %v146_v63 = vadd.f32 %v1835_v30, %v130_v56  ;;  %v432_v14 = vpop.permute.xlu2 %431 }
 0x123   :  { %v453_v29 = vmul.f32 %v1869_v42, %v432_v14 }
 0x125   :  { %v1573_v55 = vpop.eup %1572 }
 0x126   :  { %v504_v58 = vadd.f32 1.0, %v1573_v55 }
 0x128   :  { %v192_v61 = vpop.permute.xlu1 %191  ;;  %v517_v62 = vmul.f32 0.5, %v504_v58 }
 0x129   :  { %v213_v2 = vmul.f32 %v1843_v32, %v192_v61 }
 0x12a   :  { %v525_v5 = vpack.c.bf16 %v517_v62, %v516_v44 }
 0x12b   :  { %v226_v9 = vadd.f32 %v213_v2, %v146_v63  ;;  %v200_v40 = vpop.permute.xlu2 %199  ;;  %v440_v2 = vpop.permute.xlu0 %439 }
 0x12c   :  { %1317 = vmatmul.msk.bf16.vlgmr.msra.gmra.mxu3 %vm540_vm0, %v525_v5  ;;  %v215_v53 = vmul.f32 %v1843_v32, %v200_v40 }
 0x12d   :  { %v306_v11 = vadd.f32 %v293_v8, %v226_v9  ;;  %v455_v8 = vmul.f32 %v1869_v42, %v440_v2  ;;  %v1460_v2 = vld [vmem:[%s2426_s7 + $0x18] sm:$0xff] }
 0x12e   :  { %870 = vmatpush.bf16.msrb.mxu2 %v1460_v2 }
 0x12f   :  { %v386_v18 = vadd.f32 %v373_v10, %v306_v11 }
 0x131   :  { %v276_v7 = vpop.permute.xlu1 %275  ;;  %v571_v16 = vpop.f32.mrf.mxu0  ;;  %v466_v20 = vadd.f32 %v453_v29, %v386_v18 }
 0x132   :  { %v572_v17 = vadd.f32 %v2004_v60, %v571_v16  ;;  %v294_v19 = vmul.f32 %v1852_v36, %v276_v7 }
 0x133   :  { %v479_v27 = vmul.f32 0.5, %v466_v20 }
 0x134   :  { %v605_v13 = vmul.f32 0.5, %v572_v17  ;;  %v307_v33 = vadd.f32 %v294_v19, %v227_v21  ;;  %v360_v57 = vpop.permute.xlu2 %359 }
 0x135   :  { %v375_v32 = vmul.f32 %v1858_v38, %v360_v57 }
 0x136   :  { %1574 = vtanh.f32 %v605_v13 }
 0x139   :  { %v573_v22 = vpop.f32.mrf.mxu0 }
 0x13a   :  { %v574_v25 = vadd.f32 %v2004_v60, %v573_v22  ;;  %v356_v0 = vpop.permute.xlu1 %355 }
 0x13b   :  { %v374_v34 = vmul.f32 %v1858_v38, %v356_v0 }
 0x13c   :  { %v606_v1 = vmul.f32 0.5, %v574_v25  ;;  %v1575_v39 = vpop.eup %1574 }
 0x13d   :  { %v387_v35 = vadd.f32 %v374_v34, %v307_v33  ;;  %v631_v3 = vadd.f32 1.0, %v1575_v39 }
 0x13e   :  { %1576 = vtanh.f32 %v606_v1 }
 0x13f   :  { %1578 = vtanh.f32 %v479_v27  ;;  %v467_v37 = vadd.f32 %v454_v23, %v387_v35  ;;  %v644_v28 = vmul.f32 0.5, %v631_v3 }
 0x141   :  { %v480_v41 = vmul.f32 0.5, %v467_v37 }
 0x143   :  { %1580 = vtanh.f32 %v480_v41  ;;  %v117_v43 = vpop.permute.xlu1 %116 }
 0x144   :  { %v1577_v6 = vpop.eup %1576  ;;  %v132_v45 = vmul.f32 %v1820_v26, %v117_v43  ;;  %v576_v46 = vpop.f32.mrf.mxu0 }
 0x145   :  { %v1579_v47 = vpop.eup %1578  ;;  %v632_v12 = vadd.f32 1.0, %v1577_v6  ;;  %v577_v48 = vadd.f32 %v2004_v60, %v576_v46 }
 0x146   :  { %v148_v52 = vadd.f32 %v1835_v30, %v132_v45  ;;  %v505_v49 = vadd.f32 1.0, %v1579_v47 }
 0x147   :  { %v645_v51 = vmul.f32 0.5, %v632_v12  ;;  %v607_v55 = vmul.f32 0.5, %v577_v48 }
 0x148   :  { %v228_v59 = vadd.f32 %v215_v53, %v148_v52  ;;  %v518_v26 = vmul.f32 0.5, %v505_v49 }
 0x149   :  { %v1581_v54 = vpop.eup %1580  ;;  %v657_v56 = vpack.c.bf16 %v645_v51, %v644_v28  ;;  %1582 = vtanh.f32 %v607_v55 }
 0x14a   :  { %v506_v58 = vadd.f32 1.0, %v1581_v54 }
 0x14b   :  { %1328 = vmatmul.msk.bf16.vlgmr.msra.gmra.mxu1 %vm684_vm1, %v657_v56 }
 0x14c   :  { %v280_v44 = vpop.permute.xlu1 %279  ;;  %v578_v61 = vpop.f32.mrf.mxu0  ;;  %v519_v62 = vmul.f32 0.5, %v506_v58 }
 0x14d   :  { %v295_v63 = vmul.f32 %v1852_v36, %v280_v44  ;;  %v579_v30 = vadd.f32 %v2004_v60, %v578_v61 }
 0x14e   :  { %v526_v4 = vpack.c.bf16 %v519_v62, %v518_v26 }
 0x14f   :  { %v308_v5 = vadd.f32 %v295_v63, %v228_v59  ;;  %v608_v9 = vmul.f32 0.5, %v579_v30  ;;  %v1583_v11 = vpop.eup %1582 }
 0x150   :  { %1318 = vmatmul.msk.bf16.gmra.mxu3 %vm540_vm0, %v526_v4  ;;  %v633_v7 = vadd.f32 1.0, %v1583_v11  ;;  %v1458_v11 = vld [vmem:[%s2426_s7 + $0x8] sm:$0xff] }
 0x151   :  { %1584 = vtanh.f32 %v608_v9  ;;  %v388_v10 = vadd.f32 %v375_v32, %v308_v5  ;;  %v1459_v9 = vld [vmem:[%s2426_s7 + $0x10] sm:$0xff] }
 0x152   :  { %v646_v17 = vmul.f32 0.5, %v633_v7  ;;  %871 = vmatpush.bf16.msrb.mxu2 %v1459_v9 }
 0x153   :  { %v468_v14 = vadd.f32 %v455_v8, %v388_v10 }
 0x155   :  { %v481_v15 = vmul.f32 0.5, %v468_v14 }
 0x156   :  { %872 = vmatpush.bf16.msrb.mxu2 %v1458_v11 }
 0x157   :  { %v1585_v16 = vpop.eup %1584  ;;  %1586 = vtanh.f32 %v481_v15 }
 0x158   :  { %v634_v36 = vadd.f32 1.0, %v1585_v16 }
 0x15a   :  { %v647_v18 = vmul.f32 0.5, %v634_v36 }
 0x15c   :  { %v658_v38 = vpack.c.bf16 %v647_v18, %v646_v17  ;;  %v1457_v18 = vld [vmem:[%s2426_s7] sm:$0xff] }
 0x15d   :  { %v1587_v29 = vpop.eup %1586  ;;  %873 = vmatpush.bf16.msrb.mxu2 %v1457_v18 }
 0x15e   :  { %1329 = vmatmul.msk.bf16.gmra.mxu1 %vm684_vm1, %v658_v38  ;;  %v507_v31 = vadd.f32 1.0, %v1587_v29 }
 0x160   :  { %v520_v50 = vmul.f32 0.5, %v507_v31 }
 0x162   :  { %v527_v13 = vpack.c.bf16 %v520_v50, %v520_v50 }
 0x164   :  { %1319 = vmatmul.msk.bf16.gmra.mxu3 %vm540_vm0, %v527_v13  ;;  %v2056_v13 = vld [vmem:[%s2425_s6] ss:$0 sm:$0xff] }
 0x168   :  { %v581_v42 = vpop.f32.mrf.mxu0 }
 0x169   :  { %v582_v20 = vadd.f32 %v2004_v60, %v581_v42 }
 0x16b   :  { %v609_v19 = vmul.f32 0.5, %v582_v20 }
 0x16d   :  { %1588 = vtanh.f32 %v609_v19 }
 0x170   :  { %v583_v21 = vpop.f32.mrf.mxu0 }
 0x171   :  { %v584_v22 = vadd.f32 %v2004_v60, %v583_v21 }
 0x173   :  { %v610_v24 = vmul.f32 0.5, %v584_v22  ;;  %v1589_v25 = vpop.eup %1588 }
 0x174   :  { %v635_v0 = vadd.f32 1.0, %v1589_v25 }
 0x175   :  { %1590 = vtanh.f32 %v610_v24 }
 0x176   :  { %v648_v23 = vmul.f32 0.5, %v635_v0 }
 0x17b   :  { %v1591_v27 = vpop.eup %1590 }
 0x17c   :  { %v636_v33 = vadd.f32 1.0, %v1591_v27 }
 0x17e   :  { %v649_v34 = vmul.f32 0.5, %v636_v33 }
 0x180   :  { %v659_v1 = vpack.c.bf16 %v649_v34, %v648_v23 }
 0x182   :  { %1330 = vmatmul.msk.bf16.gmra.mxu1 %vm684_vm1, %v659_v1 }
 0x19e   :  { %v586_v35 = vpop.f32.mrf.mxu0 }
 0x19f   :  { %v587_v37 = vadd.f32 %v2004_v60, %v586_v35 }
 0x1a1   :  { %v611_v39 = vmul.f32 0.5, %v587_v37 }
 0x1a3   :  { %1592 = vtanh.f32 %v611_v39 }
 0x1a6   :  { %v588_v40 = vpop.f32.mrf.mxu0 }
 0x1a7   :  { %v589_v41 = vadd.f32 %v2004_v60, %v588_v40 }
 0x1a9   :  { %v612_v3 = vmul.f32 0.5, %v589_v41  ;;  %v1593_v43 = vpop.eup %1592 }
 0x1aa   :  { %v637_v45 = vadd.f32 1.0, %v1593_v43 }
 0x1ab   :  { %1594 = vtanh.f32 %v612_v3 }
 0x1ac   :  { %v650_v48 = vmul.f32 0.5, %v637_v45 }
 0x1af   :  { %v591_v6 = vpop.f32.mrf.mxu3 }
 0x1b0   :  { %v592_v46 = vadd.f32 %v2004_v60, %v591_v6 }
 0x1b1   :  { %v1595_v47 = vpop.eup %1594 }
 0x1b2   :  { %v638_v12 = vadd.f32 1.0, %v1595_v47  ;;  %v613_v51 = vmul.f32 0.5, %v592_v46 }
 0x1b4   :  { %v651_v28 = vmul.f32 0.5, %v638_v12  ;;  %1596 = vtanh.f32 %v613_v51 }
 0x1b6   :  { %v660_v52 = vpack.c.bf16 %v651_v28, %v650_v48 }
 0x1b7   :  { %v593_v53 = vpop.f32.mrf.mxu3 }
 0x1b8   :  { %v594_v49 = vadd.f32 %v2004_v60, %v593_v53  ;;  %1331 = vmatmul.msk.bf16.gmra.mxu1 %vm684_vm1, %v660_v52 }
 0x1ba   :  { %v614_v54 = vmul.f32 0.5, %v594_v49  ;;  %v1597_v55 = vpop.eup %1596 }
 0x1bb   :  { %v639_v56 = vadd.f32 1.0, %v1597_v55 }
 0x1bc   :  { %1598 = vtanh.f32 %v614_v54 }
 0x1bd   :  { %v652_v59 = vmul.f32 0.5, %v639_v56 }
 0x1c2   :  { %v1599_v57 = vpop.eup %1598 }
 0x1c3   :  { %v640_v58 = vadd.f32 1.0, %v1599_v57 }
 0x1c5   :  { %v653_v26 = vmul.f32 0.5, %v640_v58 }
 0x1c7   :  { %v661_v44 = vpack.c.bf16 %v653_v26, %v652_v59 }
 0x1c8   :  { %v715_v5 = vpop.f32.mrf.mxu1 }
 0x1c9   :  { %1332 = vmatmul.msk.bf16.vlgmr.msra.gmra.mxu2 %vm684_vm1, %v661_v44  ;;  %v716_v21 = vadd.f32 %v2056_v13, %v715_v5 }
 0x1cb   :  { %v749_v25 = vmul.f32 0.5, %v716_v21  ;;  %v1444_v21 = vld [vmem:[%s2428_s9 + $0xa8] sm:$0xf] }
 0x1d0   :  { %v717_v29 = vpop.f32.mrf.mxu1 }
 0x1d1   :  { %v718_v42 = vadd.f32 %v2056_v13, %v717_v29 }
 0x1d3   :  { %v596_v61 = vpop.f32.mrf.mxu3  ;;  %v750_v22 = vmul.f32 0.5, %v718_v42 }
 0x1d4   :  { %v597_v62 = vadd.f32 %v2004_v60, %v596_v61 }
 0x1d6   :  { %v615_v63 = vmul.f32 0.5, %v597_v62 }
 0x1d8   :  { %1600 = vtanh.f32 %v615_v63 }
 0x1db   :  { %v598_v30 = vpop.f32.mrf.mxu3  ;;  %v720_v20 = vpop.f32.mrf.mxu1 }
 0x1dc   :  { %v599_v32 = vadd.f32 %v2004_v60, %v598_v30  ;;  %v721_v35 = vadd.f32 %v2056_v13, %v720_v20 }
 0x1de   :  { %v616_v4 = vmul.f32 0.5, %v599_v32  ;;  %v1601_v8 = vpop.eup %1600  ;;  %v751_v3 = vmul.f32 0.5, %v721_v35  ;;  %v1480_v35 = vld [vmem:[%s2428_s9 + $0x98] sm:$0xf0] }
 0x1df   :  { %v641_v10 = vadd.f32 1.0, %v1601_v8 }
 0x1e0   :  { %1602 = vtanh.f32 %v616_v4 }
 0x1e1   :  { %v654_v36 = vmul.f32 0.5, %v641_v10 }
 0x1e3   :  { %v722_v27 = vpop.f32.mrf.mxu1 }
 0x1e4   :  { %v723_v34 = vadd.f32 %v2056_v13, %v722_v27  ;;  %v1452_v27 = vld [vmem:[%s2428_s9 + $0xb0] sm:$0xf] }
 0x1e6   :  { %v1603_v14 = vpop.eup %1602  ;;  %v752_v40 = vmul.f32 0.5, %v723_v34 }
 0x1e7   :  { %v642_v15 = vadd.f32 1.0, %v1603_v14  ;;  %v601_v7 = vpop.f32.mrf.mxu3 }
 0x1e8   :  { %v602_v16 = vadd.f32 %v2004_v60, %v601_v7 }
 0x1e9   :  { %v655_v17 = vmul.f32 0.5, %v642_v15 }
 0x1ea   :  { %v617_v38 = vmul.f32 0.5, %v602_v16 }
 0x1eb   :  { %v662_v31 = vpack.c.bf16 %v655_v17, %v654_v36 }
 0x1ec   :  { %1604 = vtanh.f32 %v617_v38 }
 0x1ed   :  { %1333 = vmatmul.msk.bf16.gmra.mxu2 %vm684_vm1, %v662_v31  ;;  %1606 = vtanh.f32 %v750_v22  ;;  %v1483_v22 = vld [vmem:[%s2428_s9 + $0xb0] sm:$0xf0] }
 0x1ee   :  { %1608 = vtanh.f32 %v749_v25  ;;  %v1445_v25 = vor.u32 %v1483_v22, %v1444_v21  ;;  %v1372_v22 = vld [vmem:[%s2428_s9 + $0x18] sm:$0xf] }
 0x1ef   :  { %v603_v50 = vpop.f32.mrf.mxu3  ;;  %1610 = vtanh.f32 %v752_v40  ;;  %v1434_v40 = vld [vmem:[%s2428_s9 + $0x9c] sm:$0xf0] }
 0x1f0   :  { %1612 = vtanh.f32 %v751_v3  ;;  %1136 = vmatpush.bf16.msrb.mxu3 %v1445_v25  ;;  %v1481_v3 = vld [vmem:[%s2428_s9 + $0xa0] sm:$0xf0]  ;;  %v1464_v25 = vld [vmem:[%s2428_s9 + $0x1c] sm:$0xf] }
 0x1f2   :  { %v1605_v60 = vpop.eup %1604 }
 0x1f3   :  { %v643_v19 = vadd.f32 1.0, %v1605_v60  ;;  %v1607_v33 = vpop.eup %1606 }
 0x1f4   :  { %v1609_v23 = vpop.eup %1608  ;;  %v776_v1 = vadd.f32 1.0, %v1607_v33  ;;  %v1484_v33 = vld [vmem:[%s2428_s9 + $0xb8] sm:$0xf0] }
 0x1f5   :  { %v656_v24 = vmul.f32 0.5, %v643_v19  ;;  %v775_v37 = vadd.f32 1.0, %v1609_v23  ;;  %v1611_v46 = vpop.eup %1610  ;;  %v1453_v34 = vor.u32 %v1484_v33, %v1452_v27  ;;  %v1374_v27 = vld [vmem:[%s2428_s9 + $0x24] sm:$0xf0]  ;;  %v1466_v33 = vld [vmem:[%s2428_s9 + $0x28] sm:$0xf0] }
 0x1f6   :  { %v789_v41 = vmul.f32 0.5, %v776_v1  ;;  %v1613_v47 = vpop.eup %1612  ;;  %v778_v48 = vadd.f32 1.0, %v1611_v46  ;;  %v1432_v1 = vld [vmem:[%s2428_s9 + $0x90] sm:$0xf] }
 0x1f7   :  { %v663_v0 = vpack.c.bf16 %v656_v24, %v656_v24  ;;  %v788_v43 = vmul.f32 0.5, %v775_v37  ;;  %v777_v51 = vadd.f32 1.0, %v1613_v47  ;;  %v1482_v24 = vld [vmem:[%s2428_s9 + $0xac] sm:$0xf]  ;;  %1222 = vmatpush.bf16.msrb.mxu1 %v1453_v34  ;;  %v1479_v37 = vld [vmem:[%s2428_s9 + $0x94] sm:$0xf] }
 0x1f8   :  { %v791_v53 = vmul.f32 0.5, %v778_v48  ;;  %v1420_v47 = vld [vmem:[%s2428_s9 + $0x78] sm:$0xf]  ;;  %v1476_v48 = vld [vmem:[%s2428_s9 + $0x7c] sm:$0xf] }
 0x1f9   :  { %v801_v6 = vpack.c.bf16 %v789_v41, %v788_v43  ;;  %v790_v54 = vmul.f32 0.5, %v777_v51  ;;  %v1440_v41 = vld [vmem:[%s2428_s9 + $0x98] sm:$0xf]  ;;  %v1437_v43 = vor.u32 %v1479_v37, %v1434_v40  ;;  %v1422_v51 = vld [vmem:[%s2428_s9 + $0x84] sm:$0xf0] }
 0x1fa   :  { %v1462_v40 = vld [vmem:[%s2428_s9 + $0x8] sm:$0xf0] }
 0x1fb   :  { %v802_v55 = vpack.c.bf16 %v791_v53, %v790_v54  ;;  %v1478_v53 = vld [vmem:[%s2428_s9 + $0x88] sm:$0xf0]  ;;  %v1425_v54 = vor.u32 %v1476_v48, %v1422_v51 }
 0x1fd   :  { %1334 = vmatmul.msk.bf16.gmra.mxu2 %vm684_vm1, %v663_v0  ;;  %v1446_v0 = vld [vmem:[%s2428_s9 + $0xb4] sm:$0xf0] }
 0x1fe   :  { %v1449_v23 = vor.u32 %v1482_v24, %v1446_v0  ;;  %v1465_v24 = vld [vmem:[%s2428_s9 + $0x20] sm:$0xf0] }
 0x1ff   :  { %v725_v39 = vpop.f32.mrf.mxu1  ;;  %v1373_v0 = vor.u32 %v1465_v24, %v1372_v22 }
 0x200   :  { %v726_v28 = vadd.f32 %v2056_v13, %v725_v39  ;;  %1179 = vmatpush.bf16.msrb.mxu0 %v1449_v23  ;;  %v1433_v39 = vor.u32 %v1480_v35, %v1432_v1  ;;  %v1377_v1 = vor.u32 %v1464_v25, %v1374_v27 }
 0x202   :  { %v753_v49 = vmul.f32 0.5, %v726_v28  ;;  %1137 = vmatpush.bf16.msrb.mxu3 %v1433_v39  ;;  %v1360_v39 = vld [vmem:[%s2428_s9] sm:$0xf] }
 0x204   :  { %1180 = vmatpush.bf16.msrb.mxu0 %v1437_v43 }
 0x207   :  { %v727_v45 = vpop.f32.mrf.mxu1 }
 0x208   :  { %v728_v12 = vadd.f32 %v2056_v13, %v727_v45  ;;  %1181 = vmatpush.bf16.msrb.mxu0 %v1425_v54 }
 0x20a   :  { %v754_v52 = vmul.f32 0.5, %v728_v12  ;;  %v1477_v12 = vld [vmem:[%s2428_s9 + $0x80] sm:$0xf0] }
 0x20b   :  { %v1421_v28 = vor.u32 %v1477_v12, %v1420_v47  ;;  %v1463_v12 = vld [vmem:[%s2428_s9 + $0x10] sm:$0xf0] }
 0x20c   :  { %1614 = vtanh.f32 %v754_v52  ;;  %v1428_v52 = vld [vmem:[%s2428_s9 + $0x80] sm:$0xf] }
 0x20d   :  { %1351 = vmatmul.msk.bf16.vlgmr.msrb.gmra.mxu2 %vm844_vm2, %v801_v6  ;;  %1616 = vtanh.f32 %v753_v49  ;;  %v1441_v6 = vor.u32 %v1481_v3, %v1440_v41  ;;  %1138 = vmatpush.bf16.msrb.mxu3 %v1421_v28  ;;  %v1461_v41 = vld [vmem:[%s2428_s9 + $0x4] sm:$0xf] }
 0x20f   :  { %1223 = vmatpush.bf16.msrb.mxu1 %v1441_v6  ;;  %v1361_v6 = vor.u32 %v1462_v40, %v1360_v39 }
 0x212   :  { %v1615_v56 = vpop.eup %1614 }
 0x213   :  { %v1617_v57 = vpop.eup %1616  ;;  %v780_v58 = vadd.f32 1.0, %v1615_v56  ;;  %v1408_v56 = vld [vmem:[%s2428_s9 + $0x60] sm:$0xf] }
 0x214   :  { %v779_v59 = vadd.f32 1.0, %v1617_v57  ;;  %v1474_v57 = vld [vmem:[%s2428_s9 + $0x68] sm:$0xf0] }
 0x215   :  { %v793_v26 = vmul.f32 0.5, %v780_v58  ;;  %v1473_v58 = vld [vmem:[%s2428_s9 + $0x64] sm:$0xf] }
 0x216   :  { %v792_v44 = vmul.f32 0.5, %v779_v59  ;;  %v1409_v59 = vor.u32 %v1474_v57, %v1408_v56 }
 0x218   :  { %v803_v61 = vpack.c.bf16 %v793_v26, %v792_v44  ;;  %v1410_v26 = vld [vmem:[%s2428_s9 + $0x6c] sm:$0xf0]  ;;  %v1416_v44 = vld [vmem:[%s2428_s9 + $0x68] sm:$0xf]  ;;  %1139 = vmatpush.bf16.msrb.mxu3 %v1409_v59 }
 0x21d   :  { %1352 = vmatmul.msk.bf16.gmra.mxu2 %vm844_vm2, %v802_v55  ;;  %v1429_v55 = vor.u32 %v1478_v53, %v1428_v52  ;;  %v2225_v53 = vld [vmem:[%s2427_s8] ss:$0 sm:$0xff] }
 0x21f   :  { %1224 = vmatpush.bf16.msrb.mxu1 %v1429_v55 }
 0x22d   :  { %1353 = vmatmul.msk.bf16.gmra.mxu2 %vm844_vm2, %v803_v61  ;;  %v1475_v61 = vld [vmem:[%s2428_s9 + $0x70] sm:$0xf0] }
 0x235   :  { %v730_v62 = vpop.f32.mrf.mxu1 }
 0x236   :  { %v731_v63 = vadd.f32 %v2056_v13, %v730_v62  ;;  %v1413_v62 = vor.u32 %v1473_v58, %v1410_v26 }
 0x238   :  { %v755_v30 = vmul.f32 0.5, %v731_v63  ;;  %v1417_v63 = vor.u32 %v1475_v61, %v1416_v44  ;;  %1182 = vmatpush.bf16.msrb.mxu0 %v1413_v62 }
 0x23a   :  { %1618 = vtanh.f32 %v755_v30  ;;  %1225 = vmatpush.bf16.msrb.mxu1 %v1417_v63 }
 0x23d   :  { %v732_v32 = vpop.f32.mrf.mxu1 }
 0x23e   :  { %v733_v2 = vadd.f32 %v2056_v13, %v732_v32 }
 0x240   :  { %v756_v4 = vmul.f32 0.5, %v733_v2  ;;  %v1619_v5 = vpop.eup %1618  ;;  %v1396_v2 = vld [vmem:[%s2428_s9 + $0x48] sm:$0xf] }
 0x241   :  { %v781_v9 = vadd.f32 1.0, %v1619_v5  ;;  %v1470_v5 = vld [vmem:[%s2428_s9 + $0x4c] sm:$0xf] }
 0x242   :  { %1620 = vtanh.f32 %v756_v4  ;;  %v1471_v4 = vld [vmem:[%s2428_s9 + $0x50] sm:$0xf0] }
 0x243   :  { %v794_v11 = vmul.f32 0.5, %v781_v9  ;;  %v1397_v9 = vor.u32 %v1471_v4, %v1396_v2 }
 0x245   :  { %1140 = vmatpush.bf16.msrb.mxu3 %v1397_v9 }
 0x248   :  { %v1621_v8 = vpop.eup %1620 }
 0x249   :  { %v782_v10 = vadd.f32 1.0, %v1621_v8  ;;  %v1398_v8 = vld [vmem:[%s2428_s9 + $0x54] sm:$0xf0] }
 0x24b   :  { %v795_v14 = vmul.f32 0.5, %v782_v10  ;;  %v1404_v10 = vld [vmem:[%s2428_s9 + $0x50] sm:$0xf] }
 0x24c   :  { %v735_v15 = vpop.f32.mrf.mxu2 }
 0x24d   :  { %v736_v7 = vadd.f32 %v2056_v13, %v735_v15  ;;  %v804_v16 = vpack.c.bf16 %v795_v14, %v794_v11  ;;  %v1472_v11 = vld [vmem:[%s2428_s9 + $0x58] sm:$0xf0]  ;;  %v1401_v15 = vor.u32 %v1470_v5, %v1398_v8 }
 0x24f   :  { %1354 = vmatmul.msk.bf16.gmra.mxu2 %vm844_vm2, %v804_v16  ;;  %v757_v36 = vmul.f32 0.5, %v736_v7  ;;  %v1405_v7 = vor.u32 %v1472_v11, %v1404_v10  ;;  %1183 = vmatpush.bf16.msrb.mxu0 %v1401_v15 }
 0x251   :  { %1622 = vtanh.f32 %v757_v36  ;;  %1226 = vmatpush.bf16.msrb.mxu1 %v1405_v7  ;;  %v1384_v36 = vld [vmem:[%s2428_s9 + $0x30] sm:$0xf] }
 0x254   :  { %v737_v17 = vpop.f32.mrf.mxu2 }
 0x255   :  { %v738_v18 = vadd.f32 %v2056_v13, %v737_v17  ;;  %v1468_v17 = vld [vmem:[%s2428_s9 + $0x38] sm:$0xf0] }
 0x257   :  { %v758_v38 = vmul.f32 0.5, %v738_v18  ;;  %v1623_v29 = vpop.eup %1622  ;;  %v1467_v18 = vld [vmem:[%s2428_s9 + $0x34] sm:$0xf] }
 0x258   :  { %v783_v31 = vadd.f32 1.0, %v1623_v29  ;;  %v1386_v29 = vld [vmem:[%s2428_s9 + $0x3c] sm:$0xf0] }
 0x259   :  { %1624 = vtanh.f32 %v758_v38  ;;  %v1385_v38 = vor.u32 %v1468_v17, %v1384_v36 }
 0x25a   :  { %v796_v42 = vmul.f32 0.5, %v783_v31  ;;  %v1392_v31 = vld [vmem:[%s2428_s9 + $0x38] sm:$0xf] }
 0x25b   :  { %1141 = vmatpush.bf16.msrb.mxu3 %v1385_v38 }
 0x25f   :  { %v1625_v50 = vpop.eup %1624  ;;  %1142 = vmatpush.bf16.msrb.mxu3 %v1373_v0 }
 0x260   :  { %v784_v60 = vadd.f32 1.0, %v1625_v50  ;;  %v1389_v50 = vor.u32 %v1467_v18, %v1386_v29 }
 0x262   :  { %v797_v20 = vmul.f32 0.5, %v784_v60  ;;  %v1469_v60 = vld [vmem:[%s2428_s9 + $0x40] sm:$0xf0]  ;;  %1184 = vmatpush.bf16.msrb.mxu0 %v1389_v50 }
 0x263   :  { %1143 = vmatpush.bf16.msrb.mxu3 %v1361_v6 }
 0x264   :  { %v805_v19 = vpack.c.bf16 %v797_v20, %v796_v42 }
 0x266   :  { %1355 = vmatmul.msk.bf16.gmra.mxu2 %vm844_vm2, %v805_v19  ;;  %v1393_v19 = vor.u32 %v1469_v60, %v1392_v31  ;;  %1185 = vmatpush.bf16.msrb.mxu0 %v1377_v1 }
 0x268   :  { %1227 = vmatpush.bf16.msrb.mxu1 %v1393_v19 }
 0x270   :  { %v740_v45 = vpop.f32.mrf.mxu2 }
 0x271   :  { %v741_v46 = vadd.f32 %v2056_v13, %v740_v45  ;;  %v1362_v45 = vld [vmem:[%s2428_s9 + $0xc] sm:$0xf0] }
 0x272   :  { %v1365_v47 = vor.u32 %v1461_v41, %v1362_v45 }
 0x273   :  { %v759_v49 = vmul.f32 0.5, %v741_v46  ;;  %v1368_v46 = vld [vmem:[%s2428_s9 + $0x8] sm:$0xf] }
 0x274   :  { %v1369_v51 = vor.u32 %v1463_v12, %v1368_v46  ;;  %1186 = vmatpush.bf16.msrb.mxu0 %v1365_v47 }
 0x275   :  { %1626 = vtanh.f32 %v759_v49 }
 0x278   :  { %v742_v30 = vpop.f32.mrf.mxu2 }
 0x279   :  { %v743_v32 = vadd.f32 %v2056_v13, %v742_v30 }
 0x27b   :  { %v760_v14 = vmul.f32 0.5, %v743_v32  ;;  %v1627_v16 = vpop.eup %1626 }
 0x27c   :  { %v785_v42 = vadd.f32 1.0, %v1627_v16 }
 0x27d   :  { %1628 = vtanh.f32 %v760_v14 }
 0x27e   :  { %v798_v3 = vmul.f32 0.5, %v785_v42 }
 0x280   :  { %v745_v20 = vpop.f32.mrf.mxu2 }
 0x281   :  { %v746_v21 = vadd.f32 %v2056_v13, %v745_v20  ;;  %v1380_v13 = vld [vmem:[%s2428_s9 + $0x20] sm:$0xf] }
 0x282   :  { %v1381_v35 = vor.u32 %v1466_v33, %v1380_v13 }
 0x283   :  { %v1629_v23 = vpop.eup %1628  ;;  %v761_v34 = vmul.f32 0.5, %v746_v21 }
 0x284   :  { %v786_v37 = vadd.f32 1.0, %v1629_v23  ;;  %1228 = vmatpush.bf16.msrb.mxu1 %v1381_v35 }
 0x285   :  { %1630 = vtanh.f32 %v761_v34 }
 0x286   :  { %v799_v43 = vmul.f32 0.5, %v786_v37 }
 0x288   :  { %v747_v48 = vpop.f32.mrf.mxu2  ;;  %v806_v28 = vpack.c.bf16 %v799_v43, %v798_v3  ;;  %1229 = vmatpush.bf16.msrb.mxu1 %v1369_v51 }
 0x28a   :  { %1356 = vmatmul.msk.bf16.gmra.mxu2 %vm844_vm2, %v806_v28 }
 0x28b   :  { %v1631_v52 = vpop.eup %1630 }
 0x28c   :  { %v787_v49 = vadd.f32 1.0, %v1631_v52 }
 0x28e   :  { %v800_v56 = vmul.f32 0.5, %v787_v49 }
 0x290   :  { %v875_v54 = vpop.f32.mrf.mxu2  ;;  %v807_v59 = vpack.c.bf16 %v800_v56, %v800_v56 }
 0x291   :  { %v876_v55 = vadd.f32 %v2225_v53, %v875_v54 }
 0x293   :  { %v909_v57 = vmul.f32 0.5, %v876_v55 }
 0x295   :  { %1632 = vtanh.f32 %v909_v57 }
 0x298   :  { %v877_v58 = vpop.f32.mrf.mxu2 }
 0x299   :  { %v878_v26 = vadd.f32 %v2225_v53, %v877_v58 }
 0x29a   :  { %1357 = vmatmul.msk.bf16.gmra.mxu2 %vm844_vm2, %v807_v59 }
 0x29b   :  { %v910_v44 = vmul.f32 0.5, %v878_v26  ;;  %v1633_v61 = vpop.eup %1632 }
 0x29c   :  { %v935_v30 = vadd.f32 1.0, %v1633_v61 }
 0x29d   :  { %1634 = vtanh.f32 %v910_v44 }
 0x29e   :  { %v948_v5 = vmul.f32 0.5, %v935_v30 }
 0x2a0   :  { %v880_v62 = vpop.f32.mrf.mxu2 }
 0x2a1   :  { %v881_v63 = vadd.f32 %v2225_v53, %v880_v62 }
 0x2a3   :  { %v1635_v32 = vpop.eup %1634  ;;  %v911_v4 = vmul.f32 0.5, %v881_v63 }
 0x2a4   :  { %v936_v2 = vadd.f32 1.0, %v1635_v32 }
 0x2a5   :  { %1636 = vtanh.f32 %v911_v4 }
 0x2a6   :  { %v949_v9 = vmul.f32 0.5, %v936_v2 }
 0x2a8   :  { %v882_v8 = vpop.f32.mrf.mxu2  ;;  %v961_v10 = vpack.c.bf16 %v949_v9, %v948_v5 }
 0x2a9   :  { %v883_v11 = vadd.f32 %v2225_v53, %v882_v8  ;;  %v1000_v8 = vld [vmem:[%s2429_s10] sm:$0x7] }
 0x2aa   :  { %1144 = vmatmul.bf16.vlgmr.msrb.gmra.mxu3 %v961_v10  ;;  %1187 = vmatmul.bf16.vlgmr.msrb.gmra.mxu0 %v961_v10 }
 0x2ab   :  { %v912_v14 = vmul.f32 0.5, %v883_v11  ;;  %1230 = vmatmul.bf16.vlgmr.msrb.gmra.mxu1 %v961_v10  ;;  %v1637_v15 = vpop.eup %1636 }
 0x2ac   :  { %v937_v36 = vadd.f32 1.0, %v1637_v15 }
 0x2ad   :  { %1638 = vtanh.f32 %v912_v14  ;;  %v2244_v14 = vperm.slane %v1000_v8, 1 }
 0x2ae   :  { %v950_v29 = vmul.f32 0.5, %v937_v36 }
 0x2b0   :  { %v885_v7 = vpop.f32.mrf.mxu2 }
 0x2b1   :  { %v886_v16 = vadd.f32 %v2225_v53, %v885_v7 }
 0x2b3   :  { %v1639_v17 = vpop.eup %1638  ;;  %v913_v38 = vmul.f32 0.5, %v886_v16  ;;  %v2246_v16 = vperm.slane %v1000_v8, 2 }
 0x2b4   :  { %v938_v18 = vadd.f32 1.0, %v1639_v17 }
 0x2b5   :  { %1640 = vtanh.f32 %v913_v38 }
 0x2b6   :  { %v951_v31 = vmul.f32 0.5, %v938_v18 }
 0x2b8   :  { %v887_v50 = vpop.f32.mrf.mxu2  ;;  %v962_v60 = vpack.c.bf16 %v951_v31, %v950_v29  ;;  %v2253_v29 = vperm.slane %v1000_v8, 0 }
 0x2b9   :  { %v888_v42 = vadd.f32 %v2225_v53, %v887_v50 }
 0x2ba   :  { %1149 = vmatmul.bf16.gmra.mxu3 %v962_v60  ;;  %1192 = vmatmul.bf16.gmra.mxu0 %v962_v60 }
 0x2bb   :  { %v914_v20 = vmul.f32 0.5, %v888_v42  ;;  %1235 = vmatmul.bf16.gmra.mxu1 %v962_v60  ;;  %v1641_v19 = vpop.eup %1640 }
 0x2bc   :  { %v939_v21 = vadd.f32 1.0, %v1641_v19 }
 0x2bd   :  { %1642 = vtanh.f32 %v914_v20 }
 0x2be   :  { %v952_v25 = vmul.f32 0.5, %v939_v21 }
 0x2c3   :  { %v1643_v22 = vpop.eup %1642 }
 0x2c4   :  { %v940_v24 = vadd.f32 1.0, %v1643_v22 }
 0x2c6   :  { %v953_v0 = vmul.f32 0.5, %v940_v24 }
 0x2c8   :  { %v963_v27 = vpack.c.bf16 %v953_v0, %v952_v25 }
 0x2ca   :  { %1154 = vmatmul.bf16.gmra.mxu3 %v963_v27  ;;  %1197 = vmatmul.bf16.gmra.mxu0 %v963_v27 }
 0x2cb   :  { %1240 = vmatmul.bf16.gmra.mxu1 %v963_v27 }
 0x2d2   :  { %v890_v13 = vpop.f32.mrf.mxu2 }
 0x2d3   :  { %v891_v33 = vadd.f32 %v2225_v53, %v890_v13 }
 0x2d5   :  { %v915_v23 = vmul.f32 0.5, %v891_v33 }
 0x2d7   :  { %1644 = vtanh.f32 %v915_v23 }
 0x2da   :  { %v892_v34 = vpop.f32.mrf.mxu2 }
 0x2db   :  { %v893_v1 = vadd.f32 %v2225_v53, %v892_v34 }
 0x2dd   :  { %v916_v35 = vmul.f32 0.5, %v893_v1  ;;  %v1645_v37 = vpop.eup %1644 }
 0x2de   :  { %v941_v39 = vadd.f32 1.0, %v1645_v37 }
 0x2df   :  { %1646 = vtanh.f32 %v916_v35 }
 0x2e0   :  { %v954_v3 = vmul.f32 0.5, %v941_v39 }
 0x2e5   :  { %v1647_v40 = vpop.eup %1646 }
 0x2e6   :  { %v942_v41 = vadd.f32 1.0, %v1647_v40 }
 0x2e8   :  { %v955_v43 = vmul.f32 0.5, %v942_v41 }
 0x2e9   :  { %v895_v6 = vpop.f32.mrf.mxu2 }
 0x2ea   :  { %v896_v45 = vadd.f32 %v2225_v53, %v895_v6  ;;  %v964_v46 = vpack.c.bf16 %v955_v43, %v954_v3 }
 0x2ec   :  { %1159 = vmatmul.bf16.gmra.mxu3 %v964_v46  ;;  %1202 = vmatmul.bf16.gmra.mxu0 %v964_v46  ;;  %v917_v47 = vmul.f32 0.5, %v896_v45 }
 0x2ed   :  { %1245 = vmatmul.bf16.gmra.mxu1 %v964_v46 }
 0x2ee   :  { %1648 = vtanh.f32 %v917_v47 }
 0x2f1   :  { %v897_v12 = vpop.f32.mrf.mxu2 }
 0x2f2   :  { %v898_v48 = vadd.f32 %v2225_v53, %v897_v12 }
 0x2f4   :  { %v918_v28 = vmul.f32 0.5, %v898_v48  ;;  %v1649_v51 = vpop.eup %1648 }
 0x2f5   :  { %v943_v52 = vadd.f32 1.0, %v1649_v51 }
 0x2f6   :  { %1650 = vtanh.f32 %v918_v28 }
 0x2f7   :  { %v956_v55 = vmul.f32 0.5, %v943_v52 }
 0x2fc   :  { %v1651_v49 = vpop.eup %1650 }
 0x2fd   :  { %v944_v54 = vadd.f32 1.0, %v1651_v49 }
 0x2ff   :  { %v957_v56 = vmul.f32 0.5, %v944_v54 }
 0x301   :  { %v965_v57 = vpack.c.bf16 %v957_v56, %v956_v55 }
 0x303   :  { %1164 = vmatmul.bf16.gmra.mxu3 %v965_v57  ;;  %1207 = vmatmul.bf16.gmra.mxu0 %v965_v57 }
 0x304   :  { %1250 = vmatmul.bf16.gmra.mxu1 %v965_v57 }
 0x30d   :  { %v900_v58 = vpop.f32.mrf.mxu2 }
 0x30e   :  { %v901_v59 = vadd.f32 %v2225_v53, %v900_v58 }
 0x310   :  { %v919_v26 = vmul.f32 0.5, %v901_v59 }
 0x312   :  { %1652 = vtanh.f32 %v919_v26 }
 0x315   :  { %v902_v44 = vpop.f32.mrf.mxu2 }
 0x316   :  { %v903_v61 = vadd.f32 %v2225_v53, %v902_v44 }
 0x318   :  { %v920_v62 = vmul.f32 0.5, %v903_v61  ;;  %v1653_v63 = vpop.eup %1652 }
 0x319   :  { %v945_v2 = vadd.f32 1.0, %v1653_v63 }
 0x31a   :  { %1654 = vtanh.f32 %v920_v62 }
 0x31b   :  { %v958_v10 = vmul.f32 0.5, %v945_v2 }
 0x31d   :  { %v905_v30 = vpop.f32.mrf.mxu2 }
 0x31e   :  { %v906_v32 = vadd.f32 %v2225_v53, %v905_v30 }
 0x320   :  { %v1655_v4 = vpop.eup %1654  ;;  %v921_v5 = vmul.f32 0.5, %v906_v32 }
 0x321   :  { %v946_v9 = vadd.f32 1.0, %v1655_v4 }
 0x322   :  { %1656 = vtanh.f32 %v921_v5 }
 0x323   :  { %v959_v11 = vmul.f32 0.5, %v946_v9 }
 0x325   :  { %v907_v15 = vpop.f32.mrf.mxu2  ;;  %v966_v7 = vpack.c.bf16 %v959_v11, %v958_v10 }
 0x327   :  { %1169 = vmatmul.bf16.gmra.mxu3 %v966_v7  ;;  %v1188_v36 = vpop.f32.mrf.mxu0  ;;  %1212 = vmatmul.bf16.gmra.mxu0 %v966_v7 }
 0x328   :  { %v1189_v53 = vadd.f32 %v1188_v36, %v2244_v14  ;;  %v1231_v17 = vpop.f32.mrf.mxu1  ;;  %1255 = vmatmul.bf16.gmra.mxu1 %v966_v7  ;;  %v1657_v38 = vpop.eup %1656 }
 0x329   :  { %v1232_v18 = vadd.f32 %v1231_v17, %v2246_v16  ;;  %v947_v31 = vadd.f32 1.0, %v1657_v38 }
 0x32a   :  { %1266 = vst [vmem:[%s2430_s11 + $0x8] sm:$0xff] %v1189_v53 }
 0x32b   :  { %1268 = vst.msk [vmem:[%s2430_s11 + $0x10] sm:$0xff] %vm1267_vm3, %v1232_v18  ;;  %v960_v21 = vmul.f32 0.5, %v947_v31 }
 0x32d   :  { %v1145_v50 = vpop.f32.mrf.mxu3  ;;  %v967_v25 = vpack.c.bf16 %v960_v21, %v960_v21 }
 0x32e   :  { %v1146_v60 = vadd.f32 %v1145_v50, %v2253_v29 }
 0x32f   :  { %v1190_v42 = vpop.f32.mrf.mxu0 }
 0x330   :  { %1265 = vst [vmem:[%s2430_s11] sm:$0xff] %v1146_v60  ;;  %v1191_v20 = vadd.f32 %v1190_v42, %v2244_v14  ;;  %v1233_v19 = vpop.f32.mrf.mxu1 }
 0x331   :  { %v1234_v22 = vadd.f32 %v1233_v19, %v2246_v16 }
 0x332   :  { %1270 = vst [vmem:[%s2430_s11 + $0x20] sm:$0xff] %v1191_v20 }
 0x333   :  { %1271 = vst.msk [vmem:[%s2430_s11 + $0x28] sm:$0xff] %vm1267_vm3, %v1234_v22 }
 0x335   :  { %v1147_v24 = vpop.f32.mrf.mxu3 }
 0x336   :  { %v1148_v0 = vadd.f32 %v1147_v24, %v2253_v29 }
 0x337   :  { %1174 = vmatmul.bf16.gmra.mxu3 %v967_v25  ;;  %v1193_v27 = vpop.f32.mrf.mxu0  ;;  %1217 = vmatmul.bf16.gmra.mxu0 %v967_v25 }
 0x338   :  { %1269 = vst [vmem:[%s2430_s11 + $0x18] sm:$0xff] %v1148_v0  ;;  %v1194_v13 = vadd.f32 %v1193_v27, %v2244_v14  ;;  %v1236_v33 = vpop.f32.mrf.mxu1  ;;  %1260 = vmatmul.bf16.gmra.mxu1 %v967_v25 }
 0x339   :  { %v1237_v23 = vadd.f32 %v1236_v33, %v2246_v16 }
 0x33a   :  { %1273 = vst [vmem:[%s2430_s11 + $0x38] sm:$0xff] %v1194_v13 }
 0x33b   :  { %1274 = vst.msk [vmem:[%s2430_s11 + $0x40] sm:$0xff] %vm1267_vm3, %v1237_v23 }
 0x33d   :  { %v1150_v34 = vpop.f32.mrf.mxu3 }
 0x33e   :  { %v1151_v1 = vadd.f32 %v1150_v34, %v2253_v29 }
 0x33f   :  { %v1195_v35 = vpop.f32.mrf.mxu0 }
 0x340   :  { %1272 = vst [vmem:[%s2430_s11 + $0x30] sm:$0xff] %v1151_v1  ;;  %v1196_v37 = vadd.f32 %v1195_v35, %v2244_v14  ;;  %v1238_v39 = vpop.f32.mrf.mxu1 }
 0x341   :  { %v1239_v40 = vadd.f32 %v1238_v39, %v2246_v16 }
 0x342   :  { %1276 = vst [vmem:[%s2430_s11 + $0x50] sm:$0xff] %v1196_v37 }
 0x343   :  { %1277 = vst.msk [vmem:[%s2430_s11 + $0x58] sm:$0xff] %vm1267_vm3, %v1239_v40 }
 0x345   :  { %v1152_v41 = vpop.f32.mrf.mxu3 }
 0x346   :  { %v1153_v3 = vadd.f32 %v1152_v41, %v2253_v29 }
 0x347   :  { %v1198_v43 = vpop.f32.mrf.mxu0 }
 0x348   :  { %1275 = vst [vmem:[%s2430_s11 + $0x48] sm:$0xff] %v1153_v3  ;;  %v1199_v6 = vadd.f32 %v1198_v43, %v2244_v14  ;;  %v1241_v45 = vpop.f32.mrf.mxu1 }
 0x349   :  { %v1242_v46 = vadd.f32 %v1241_v45, %v2246_v16 }
 0x34a   :  { %1279 = vst [vmem:[%s2430_s11 + $0x68] sm:$0xff] %v1199_v6 }
 0x34b   :  { %1280 = vst.msk [vmem:[%s2430_s11 + $0x70] sm:$0xff] %vm1267_vm3, %v1242_v46 }
 0x34d   :  { %v1155_v47 = vpop.f32.mrf.mxu3 }
 0x34e   :  { %v1156_v12 = vadd.f32 %v1155_v47, %v2253_v29 }
 0x34f   :  { %v1200_v48 = vpop.f32.mrf.mxu0 }
 0x350   :  { %1278 = vst [vmem:[%s2430_s11 + $0x60] sm:$0xff] %v1156_v12  ;;  %v1201_v28 = vadd.f32 %v1200_v48, %v2244_v14  ;;  %v1243_v51 = vpop.f32.mrf.mxu1 }
 0x351   :  { %v1244_v52 = vadd.f32 %v1243_v51, %v2246_v16 }
 0x352   :  { %1282 = vst [vmem:[%s2430_s11 + $0x80] sm:$0xff] %v1201_v28 }
 0x353   :  { %1283 = vst.msk [vmem:[%s2430_s11 + $0x88] sm:$0xff] %vm1267_vm3, %v1244_v52 }
 0x355   :  { %v1157_v49 = vpop.f32.mrf.mxu3 }
 0x356   :  { %v1158_v54 = vadd.f32 %v1157_v49, %v2253_v29 }
 0x358   :  { %1281 = vst [vmem:[%s2430_s11 + $0x78] sm:$0xff] %v1158_v54 }
 0x369   :  { %v1203_v55 = vpop.f32.mrf.mxu0 }
 0x36a   :  { %v1204_v56 = vadd.f32 %v1203_v55, %v2244_v14  ;;  %v1246_v57 = vpop.f32.mrf.mxu1 }
 0x36b   :  { %v1247_v58 = vadd.f32 %v1246_v57, %v2246_v16 }
 0x36c   :  { %1285 = vst [vmem:[%s2430_s11 + $0x98] sm:$0xff] %v1204_v56 }
 0x36d   :  { %1286 = vst.msk [vmem:[%s2430_s11 + $0xa0] sm:$0xff] %vm1267_vm3, %v1247_v58 }
 0x36f   :  { %v1160_v59 = vpop.f32.mrf.mxu3 }
 0x370   :  { %v1161_v26 = vadd.f32 %v1160_v59, %v2253_v29 }
 0x371   :  { %v1205_v44 = vpop.f32.mrf.mxu0 }
 0x372   :  { %1284 = vst [vmem:[%s2430_s11 + $0x90] sm:$0xff] %v1161_v26  ;;  %v1206_v61 = vadd.f32 %v1205_v44, %v2244_v14  ;;  %v1248_v62 = vpop.f32.mrf.mxu1 }
 0x373   :  { %v1249_v63 = vadd.f32 %v1248_v62, %v2246_v16 }
 0x374   :  { %1288 = vst [vmem:[%s2430_s11 + $0xb0] sm:$0xff] %v1206_v61 }
 0x375   :  { %1289 = vst.msk [vmem:[%s2430_s11 + $0xb8] sm:$0xff] %vm1267_vm3, %v1249_v63 }
 0x377   :  { %v1162_v30 = vpop.f32.mrf.mxu3 }
 0x378   :  { %v1163_v32 = vadd.f32 %v1162_v30, %v2253_v29 }
 0x37a   :  { %1287 = vst [vmem:[%s2430_s11 + $0xa8] sm:$0xff] %v1163_v32 }
 0x380   :  { %v1208_v2 = vpop.f32.mrf.mxu0 }
 0x381   :  { %v1209_v4 = vadd.f32 %v1208_v2, %v2244_v14  ;;  %v1251_v5 = vpop.f32.mrf.mxu1 }
 0x382   :  { %v1252_v9 = vadd.f32 %v1251_v5, %v2246_v16 }
 0x383   :  { %1291 = vst [vmem:[%s2430_s11 + $0xc8] sm:$0xff] %v1209_v4 }
 0x384   :  { %1292 = vst.msk [vmem:[%s2430_s11 + $0xd0] sm:$0xff] %vm1267_vm3, %v1252_v9 }
 0x386   :  { %v1165_v8 = vpop.f32.mrf.mxu3 }
 0x387   :  { %v1166_v10 = vadd.f32 %v1165_v8, %v2253_v29 }
 0x388   :  { %v1210_v11 = vpop.f32.mrf.mxu0 }
 0x389   :  { %1290 = vst [vmem:[%s2430_s11 + $0xc0] sm:$0xff] %v1166_v10  ;;  %v1211_v15 = vadd.f32 %v1210_v11, %v2244_v14  ;;  %v1253_v7 = vpop.f32.mrf.mxu1 }
 0x38a   :  { %v1254_v36 = vadd.f32 %v1253_v7, %v2246_v16 }
 0x38b   :  { %1294 = vst [vmem:[%s2430_s11 + $0xe0] sm:$0xff] %v1211_v15 }
 0x38c   :  { %1295 = vst.msk [vmem:[%s2430_s11 + $0xe8] sm:$0xff] %vm1267_vm3, %v1254_v36 }
 0x38e   :  { %v1167_v53 = vpop.f32.mrf.mxu3 }
 0x38f   :  { %v1168_v17 = vadd.f32 %v1167_v53, %v2253_v29 }
 0x391   :  { %1293 = vst [vmem:[%s2430_s11 + $0xd8] sm:$0xff] %v1168_v17 }
 0x3a4   :  { %v1213_v18 = vpop.f32.mrf.mxu0 }
 0x3a5   :  { %v1214_v38 = vadd.f32 %v1213_v18, %v2244_v14  ;;  %v1256_v31 = vpop.f32.mrf.mxu1 }
 0x3a6   :  { %v1257_v50 = vadd.f32 %v1256_v31, %v2246_v16 }
 0x3a7   :  { %1297 = vst [vmem:[%s2430_s11 + $0xf8] sm:$0xff] %v1214_v38 }
 0x3a8   :  { %1298 = vst.msk [vmem:[%s2430_s11 + $0x100] sm:$0xff] %vm1267_vm3, %v1257_v50 }
 0x3aa   :  { %v1170_v60 = vpop.f32.mrf.mxu3 }
 0x3ab   :  { %v1171_v42 = vadd.f32 %v1170_v60, %v2253_v29 }
 0x3ac   :  { %v1215_v20 = vpop.f32.mrf.mxu0 }
 0x3ad   :  { %1296 = vst [vmem:[%s2430_s11 + $0xf0] sm:$0xff] %v1171_v42  ;;  %v1216_v19 = vadd.f32 %v1215_v20, %v2244_v14  ;;  %v1258_v21 = vpop.f32.mrf.mxu1 }
 0x3ae   :  { %v1259_v22 = vadd.f32 %v1258_v21, %v2246_v16 }
 0x3af   :  { %1300 = vst [vmem:[%s2430_s11 + $0x110] sm:$0xff] %v1216_v19 }
 0x3b0   :  { %1301 = vst.msk [vmem:[%s2430_s11 + $0x118] sm:$0xff] %vm1267_vm3, %v1259_v22 }
 0x3b2   :  { %v1172_v24 = vpop.f32.mrf.mxu3 }
 0x3b3   :  { %v1173_v25 = vadd.f32 %v1172_v24, %v2253_v29 }
 0x3b4   :  { %v1218_v0 = vpop.f32.mrf.mxu0 }
 0x3b5   :  { %1299 = vst [vmem:[%s2430_s11 + $0x108] sm:$0xff] %v1173_v25  ;;  %v1219_v27 = vadd.f32 %v1218_v0, %v2244_v14  ;;  %v1261_v13 = vpop.f32.mrf.mxu1 }
 0x3b6   :  { %v1262_v33 = vadd.f32 %v1261_v13, %v2246_v16 }
 0x3b7   :  { %1303 = vst [vmem:[%s2430_s11 + $0x128] sm:$0xff] %v1219_v27 }
 0x3b8   :  { %1304 = vst.msk [vmem:[%s2430_s11 + $0x130] sm:$0xff] %vm1267_vm3, %v1262_v33 }
 0x3ba   :  { %v1175_v23 = vpop.f32.mrf.mxu3 }
 0x3bb   :  { %v1176_v34 = vadd.f32 %v1175_v23, %v2253_v29 }
 0x3bc   :  { %v1220_v1 = vpop.f32.mrf.mxu0 }
 0x3bd   :  { %1302 = vst [vmem:[%s2430_s11 + $0x120] sm:$0xff] %v1176_v34  ;;  %v1263_v14 = vpop.f32.mrf.mxu1 }
 0x3c2   :  { %v1177_v35 = vpop.f32.mrf.mxu3 }

</bundles_post_ra>
